<compile_context>
chip_gen: v7x
topology: tpu7x:2x2x1
jax: 0.10.0
libtpu: 0.0.40
codegen_flags: <defaults>
</compile_context>

<pallas_src>
from functools import partial

import jax
import jax.numpy as jnp
from jax.experimental import pallas as pl
from jax.experimental.pallas import tpu as pltpu


def _round_up(x, m):
    return (x + m - 1) // m * m


def _pick_th(h_out, w_out, kkc_pad, bytes_budget=4 * 1024 * 1024):
    """Largest H-tile dividing H_out whose im2col patch stays under the VMEM budget."""
    best = 1
    for d in range(1, h_out + 1):
        if h_out % d == 0 and d * w_out * kkc_pad * 2 <= bytes_budget:
            best = d
    return best


def _basic_conv_kernel(x_main_ref, x_halo_ref, w_ref, shift_ref, o_ref,
                       band_ref, patch_ref, *,
                       K, stride, TH, W_out, Cin_p, KKC, KKC_pad, TH_in,
                       main_copy, halo, neg_slope):
    """One grid step: one batch image, one H-tile (TH output rows), one Cout tile.

    x_main_ref: (1, TH*stride, Wp, Cin_p)   non-overlapping input row block (bf16)
    x_halo_ref: (1, halo_p, Wp, Cin_p)      bottom halo rows for this tile (bf16)
    w_ref:      (KKC_pad, TC)               im2col weights, BN scale folded in (bf16)
    shift_ref:  (1, TC)                     folded BN shift (f32)
    o_ref:      (1, TH, W_out, TC)
    band_ref:   VMEM (TH_in, Wp, Cin_p)     assembled halo'd input band (bf16)
    patch_ref:  VMEM (TH*W_out, KKC_pad)    im2col patch matrix (bf16)
    """
    M = TH * W_out

    # ---- assemble the halo'd input band for this tile ----
    main = x_main_ref[0]                                   # (TH*stride, Wp, Cin_p)
    band_ref[0:main_copy, :, :] = main[:main_copy]
    if halo > 0:
        band_ref[main_copy:TH_in, :, :] = x_halo_ref[0][:halo]

    band = band_ref[...]                                   # (TH_in, Wp, Cin_p)

    # ---- in-kernel im2col: each (kh, kw) tap's strided window -> its column block ----
    for kh in range(K):
        for kw in range(K):
            win = jax.lax.slice(
                band,
                (kh, kw, 0),
                (kh + (TH - 1) * stride + 1,
                 kw + (W_out - 1) * stride + 1,
                 Cin_p),
                (stride, stride, 1))                       # (TH, W_out, Cin_p)
            tap = kh * K + kw
            patch_ref[:, tap * Cin_p:(tap + 1) * Cin_p] = win.reshape(M, Cin_p)
    if KKC_pad > KKC:
        patch_ref[:, KKC:] = jnp.zeros((M, KKC_pad - KKC), patch_ref.dtype)

    # ---- one fat MXU matmul: contraction over all K*K*Cin at once (bf16 in, f32 acc) ----
    acc = jnp.dot(patch_ref[...], w_ref[...],
                  preferred_element_type=jnp.float32)      # (M, TC)

    # ---- fused BN shift (scale already folded into weights) + LeakyReLU ----
    y = acc + shift_ref[...]                               # (1, TC) broadcasts over M
    y = jnp.where(y > 0, y, neg_slope * y)
    o_ref[0] = y.reshape(TH, W_out, -1).astype(o_ref.dtype)


def basic_conv(x_nchw, weight_oihw, gamma, beta, running_mean, running_var,
               *, stride=1, eps=1e-5, negative_slope=0.1):
    """Forward pass of BasicConv. Input/output in PyTorch NCHW layout."""
    N, Cin, H, W = x_nchw.shape
    Cout, Cin_w, K, K2 = weight_oihw.shape
    assert Cin == Cin_w and K == K2
    assert stride <= K, "BasicConv always has stride <= kernel_size"
    pad = K // 2
    H_out = (H + 2 * pad - K) // stride + 1
    W_out = (W + 2 * pad - K) // stride + 1
    Hp, Wp = H + 2 * pad, W + 2 * pad

    # ---- padded / tiled sizes ----
    Cin_p = _round_up(Cin, 8)                 # sublane/lane friendly channel padding
    Cout_p = _round_up(Cout, 128)             # lane-dense output stores
    KKC = K * K * Cin_p                       # real contraction depth
    KKC_pad = _round_up(KKC, 128)             # MXU-friendly contraction depth

    TH = _pick_th(H_out, W_out, KKC_pad)      # output rows per grid step
    nH = H_out // TH
    MAIN_ROWS = TH * stride                   # non-overlapping input rows per tile
    TH_in = (TH - 1) * stride + K             # input rows actually needed (with halo)
    main_copy = min(MAIN_ROWS, TH_in)
    halo = TH_in - main_copy                  # duplicated bottom halo rows per tile
    halo_p = max(halo, 1)

    TC = 256 if Cout_p % 256 == 0 else 128    # Cout tile (256 feeds v6e/v7x MXU fully)
    nC = Cout_p // TC

    # ---- glue (plain JAX): layout, padding, halo gather, BN folding ----
    # TODO(synk): for best end-to-end perf keep the surrounding network in NHWC so the
    # NCHW<->NHWC transposes and the zero-pad fuse away; kept here to preserve the
    # PyTorch interface of the module.
    x_nhwc = jnp.transpose(x_nchw, (0, 2, 3, 1))
    x_pad = jnp.pad(
        x_nhwc, ((0, 0), (pad, pad), (pad, pad), (0, Cin_p - Cin))
    ).astype(jnp.bfloat16)                                        # (N, Hp, Wp, Cin_p)

    # tiny duplicated halo-row tensor: lets H tiles use plain (non-overlapping) BlockSpecs
    row0 = jnp.arange(nH) * MAIN_ROWS + main_copy
    rows = jnp.clip(row0[:, None] + jnp.arange(halo_p)[None, :], 0, Hp - 1).reshape(-1)
    x_halo = x_pad[:, rows, :, :]                                 # (N, nH*halo_p, Wp, Cin_p)

    scale = gamma / jnp.sqrt(running_var + eps)
    shift = (beta - running_mean * scale).astype(jnp.float32).reshape(1, Cout)
    shift_p = jnp.pad(shift, ((0, 0), (0, Cout_p - Cout)))        # (1, Cout_p) f32

    w_hwio = jnp.transpose(weight_oihw, (2, 3, 1, 0)) * scale[None, None, None, :]
    w_p = jnp.pad(w_hwio, ((0, 0), (0, 0), (0, Cin_p - Cin), (0, Cout_p - Cout)))
    w_col = jnp.pad(w_p.reshape(K * K * Cin_p, Cout_p),
                    ((0, KKC_pad - KKC), (0, 0))).astype(jnp.bfloat16)   # (KKC_pad, Cout_p)

    kernel = partial(_basic_conv_kernel, K=K, stride=stride, TH=TH, W_out=W_out,
                     Cin_p=Cin_p, KKC=KKC, KKC_pad=KKC_pad, TH_in=TH_in,
                     main_copy=main_copy, halo=halo, neg_slope=negative_slope)

    out_nhwc = pl.pallas_call(
        kernel,
        out_shape=jax.ShapeDtypeStruct((N, H_out, W_out, Cout_p), x_nchw.dtype),
        grid_spec=pltpu.PrefetchScalarGridSpec(
            num_scalar_prefetch=0,
            grid=(N, nH, nC),
            in_specs=[
                pl.BlockSpec((1, MAIN_ROWS, Wp, Cin_p), lambda n, h, c: (n, h, 0, 0)),
                pl.BlockSpec((1, halo_p, Wp, Cin_p), lambda n, h, c: (n, h, 0, 0)),
                pl.BlockSpec((KKC_pad, TC), lambda n, h, c: (0, c)),
                pl.BlockSpec((1, TC), lambda n, h, c: (0, c)),
            ],
            out_specs=pl.BlockSpec((1, TH, W_out, TC), lambda n, h, c: (n, h, 0, c)),
            scratch_shapes=[
                pltpu.VMEM((TH_in, Wp, Cin_p), jnp.bfloat16),       # input band
                pltpu.VMEM((TH * W_out, KKC_pad), jnp.bfloat16),    # im2col patch
            ],
        ),
        compiler_params=pltpu.CompilerParams(
            dimension_semantics=("parallel", "parallel", "parallel"),
            vmem_limit_bytes=48 * 1024 * 1024,
        ),
    )(x_pad, x_halo, w_col, shift_p)

    out_nhwc = out_nhwc[..., :Cout]
    return jnp.transpose(out_nhwc, (0, 3, 1, 2))                  # back to NCHW


def _reference(x, w, gamma, beta, mean, var, *, stride=1, eps=1e-5, match_bf16=False):
    """Plain-JAX reference. match_bf16=True applies the same bf16 input quantization as the kernel."""
    scale = gamma / jnp.sqrt(var + eps)
    shift = beta - mean * scale
    w_f = w * scale[:, None, None, None]
    x_f = x
    if match_bf16:
        x_f = x_f.astype(jnp.bfloat16).astype(jnp.float32)
        w_f = w_f.astype(jnp.bfloat16).astype(jnp.float32)
    K = w.shape[-1]
    pad = K // 2
    y = jax.lax.conv_general_dilated(
        x_f, w_f, window_strides=(stride, stride), padding=((pad, pad), (pad, pad)),
        dimension_numbers=("NCHW", "OIHW", "NCHW"),
        precision=jax.lax.Precision.HIGHEST)
    y = y + shift[None, :, None, None]
    return jnp.where(y > 0, y, 0.1 * y)


if __name__ == "__main__":
    key = jax.random.PRNGKey(0)
    k_x, k_w, k_g, k_b, k_m, k_v = jax.random.split(key, 6)

    N, Cin, H, W = 2, 4, 16, 16
    Cout, K, stride = 8, 3, 1

    x = jax.random.normal(k_x, (N, Cin, H, W), jnp.float32)
    weight = jax.random.normal(k_w, (Cout, Cin, K, K), jnp.float32) * 0.1
    gamma = 1.0 + 0.1 * jax.random.normal(k_g, (Cout,), jnp.float32)
    beta = 0.1 * jax.random.normal(k_b, (Cout,), jnp.float32)
    running_mean = 0.1 * jax.random.normal(k_m, (Cout,), jnp.float32)
    running_var = jnp.abs(1.0 + 0.1 * jax.random.normal(k_v, (Cout,), jnp.float32))

    out = basic_conv(x, weight, gamma, beta, running_mean, running_var, stride=stride)
    out = jax.block_until_ready(out)
    assert out.shape == (N, Cout, H, W)

    # tight check vs a reference with the same bf16 input quantization
    ref_q = _reference(x, weight, gamma, beta, running_mean, running_var,
                       stride=stride, match_bf16=True)
    assert jnp.allclose(out, ref_q, atol=1e-4, rtol=1e-4), "mismatch vs bf16-matched reference"

    # loose check vs the exact f32 module semantics (bf16 MXU inputs => small quantization error)
    ref = _reference(x, weight, gamma, beta, running_mean, running_var, stride=stride)
    assert jnp.allclose(out, ref, atol=5e-2, rtol=5e-2), "mismatch vs f32 reference"

    print("KERNEL_OK")
</pallas_src>

<mosaic_0001>
module attributes {stable_mosaic.version = 11 : i64} {
  func.func @_basic_conv_kernel(%arg0: i32, %arg1: i32, %arg2: i32, %arg3: memref<1x16x18x8xbf16, #tpu.memory_space<vmem>>, %arg4: memref<1x2x18x8xbf16, #tpu.memory_space<vmem>>, %arg5: memref<128x128xbf16, #tpu.memory_space<vmem>>, %arg6: memref<1x128xf32, #tpu.memory_space<vmem>>, %arg7: memref<1x16x16x128xf32, #tpu.memory_space<vmem>>, %arg8: memref<18x18x8xbf16, #tpu.memory_space<vmem>>, %arg9: memref<256x128xbf16, #tpu.memory_space<vmem>>) attributes {dimension_semantics = [#tpu.dimension_semantics<parallel>, #tpu.dimension_semantics<parallel>, #tpu.dimension_semantics<parallel>], iteration_bounds = array<i64: 2, 1, 1>, scalar_prefetch = 0 : i64, scratch_operands = 2 : i64, tpu.core_type = #tpu.core_type<tc>, window_params = [{transform_indices = @transform_0, window_bounds = array<i64: 1, 16, 18, 8>}, {transform_indices = @transform_1, window_bounds = array<i64: 1, 2, 18, 8>}, {transform_indices = @transform_2, window_bounds = array<i64: 128, 128>}, {transform_indices = @transform_3, window_bounds = array<i64: 1, 128>}, {transform_indices = @transform_4, window_bounds = array<i64: 1, 16, 16, 128>}]} {
    %c0 = arith.constant 0 : index
    %c0_0 = arith.constant 0 : index
    %c0_1 = arith.constant 0 : index
    %c0_2 = arith.constant 0 : index
    %0 = vector.load %arg3[%c0, %c0_0, %c0_1, %c0_2] : memref<1x16x18x8xbf16, #tpu.memory_space<vmem>>, vector<1x16x18x8xbf16>
    %1 = vector.shape_cast %0 : vector<1x16x18x8xbf16> to vector<16x18x8xbf16>
    %c0_3 = arith.constant 0 : index
    %c0_4 = arith.constant 0 : index
    %c0_5 = arith.constant 0 : index
    %2 = vector.load %arg8[%c0_3, %c0_4, %c0_5] : memref<18x18x8xbf16, #tpu.memory_space<vmem>>, vector<16x18x8xbf16>
    tpu.vector_store %arg8[%c0_3, %c0_4, %c0_5], %1 {strides = array<i32>} : memref<18x18x8xbf16, #tpu.memory_space<vmem>>, vector<16x18x8xbf16>,
    %c0_6 = arith.constant 0 : index
    %c0_7 = arith.constant 0 : index
    %c0_8 = arith.constant 0 : index
    %c0_9 = arith.constant 0 : index
    %3 = vector.load %arg4[%c0_6, %c0_7, %c0_8, %c0_9] : memref<1x2x18x8xbf16, #tpu.memory_space<vmem>>, vector<1x2x18x8xbf16>
    %4 = vector.shape_cast %3 : vector<1x2x18x8xbf16> to vector<2x18x8xbf16>
    %c16 = arith.constant 16 : index
    %c0_10 = arith.constant 0 : index
    %c0_11 = arith.constant 0 : index
    %5 = vector.load %arg8[%c16, %c0_10, %c0_11] : memref<18x18x8xbf16, #tpu.memory_space<vmem>>, vector<2x18x8xbf16>
    tpu.vector_store %arg8[%c16, %c0_10, %c0_11], %4 {strides = array<i32>} : memref<18x18x8xbf16, #tpu.memory_space<vmem>>, vector<2x18x8xbf16>,
    %c0_12 = arith.constant 0 : index
    %c0_13 = arith.constant 0 : index
    %c0_14 = arith.constant 0 : index
    %6 = vector.load %arg8[%c0_12, %c0_13, %c0_14] : memref<18x18x8xbf16, #tpu.memory_space<vmem>>, vector<18x18x8xbf16>
    %7 = vector.extract_strided_slice %6 {offsets = [0, 0, 0], sizes = [16, 16, 8], strides = [1, 1, 1]} : vector<18x18x8xbf16> to vector<16x16x8xbf16>
    %8 = vector.shape_cast %7 : vector<16x16x8xbf16> to vector<256x8xbf16>
    %c0_15 = arith.constant 0 : index
    %c0_16 = arith.constant 0 : index
    %9 = vector.load %arg9[%c0_15, %c0_16] : memref<256x128xbf16, #tpu.memory_space<vmem>>, vector<256x8xbf16>
    tpu.vector_store %arg9[%c0_15, %c0_16], %8 {strides = array<i32>} : memref<256x128xbf16, #tpu.memory_space<vmem>>, vector<256x8xbf16>,
    %10 = vector.extract_strided_slice %6 {offsets = [0, 1, 0], sizes = [16, 16, 8], strides = [1, 1, 1]} : vector<18x18x8xbf16> to vector<16x16x8xbf16>
    %11 = vector.shape_cast %10 : vector<16x16x8xbf16> to vector<256x8xbf16>
    %c0_17 = arith.constant 0 : index
    %c8 = arith.constant 8 : index
    %12 = vector.load %arg9[%c0_17, %c8] : memref<256x128xbf16, #tpu.memory_space<vmem>>, vector<256x8xbf16>
    tpu.vector_store %arg9[%c0_17, %c8], %11 {strides = array<i32>} : memref<256x128xbf16, #tpu.memory_space<vmem>>, vector<256x8xbf16>,
    %13 = vector.extract_strided_slice %6 {offsets = [0, 2, 0], sizes = [16, 16, 8], strides = [1, 1, 1]} : vector<18x18x8xbf16> to vector<16x16x8xbf16>
    %14 = vector.shape_cast %13 : vector<16x16x8xbf16> to vector<256x8xbf16>
    %c0_18 = arith.constant 0 : index
    %c16_19 = arith.constant 16 : index
    %15 = vector.load %arg9[%c0_18, %c16_19] : memref<256x128xbf16, #tpu.memory_space<vmem>>, vector<256x8xbf16>
    tpu.vector_store %arg9[%c0_18, %c16_19], %14 {strides = array<i32>} : memref<256x128xbf16, #tpu.memory_space<vmem>>, vector<256x8xbf16>,
    %16 = vector.extract_strided_slice %6 {offsets = [1, 0, 0], sizes = [16, 16, 8], strides = [1, 1, 1]} : vector<18x18x8xbf16> to vector<16x16x8xbf16>
    %17 = vector.shape_cast %16 : vector<16x16x8xbf16> to vector<256x8xbf16>
    %c0_20 = arith.constant 0 : index
    %c24 = arith.constant 24 : index
    %18 = vector.load %arg9[%c0_20, %c24] : memref<256x128xbf16, #tpu.memory_space<vmem>>, vector<256x8xbf16>
    tpu.vector_store %arg9[%c0_20, %c24], %17 {strides = array<i32>} : memref<256x128xbf16, #tpu.memory_space<vmem>>, vector<256x8xbf16>,
    %19 = vector.extract_strided_slice %6 {offsets = [1, 1, 0], sizes = [16, 16, 8], strides = [1, 1, 1]} : vector<18x18x8xbf16> to vector<16x16x8xbf16>
    %20 = vector.shape_cast %19 : vector<16x16x8xbf16> to vector<256x8xbf16>
    %c0_21 = arith.constant 0 : index
    %c32 = arith.constant 32 : index
    %21 = vector.load %arg9[%c0_21, %c32] : memref<256x128xbf16, #tpu.memory_space<vmem>>, vector<256x8xbf16>
    tpu.vector_store %arg9[%c0_21, %c32], %20 {strides = array<i32>} : memref<256x128xbf16, #tpu.memory_space<vmem>>, vector<256x8xbf16>,
    %22 = vector.extract_strided_slice %6 {offsets = [1, 2, 0], sizes = [16, 16, 8], strides = [1, 1, 1]} : vector<18x18x8xbf16> to vector<16x16x8xbf16>
    %23 = vector.shape_cast %22 : vector<16x16x8xbf16> to vector<256x8xbf16>
    %c0_22 = arith.constant 0 : index
    %c40 = arith.constant 40 : index
    %24 = vector.load %arg9[%c0_22, %c40] : memref<256x128xbf16, #tpu.memory_space<vmem>>, vector<256x8xbf16>
    tpu.vector_store %arg9[%c0_22, %c40], %23 {strides = array<i32>} : memref<256x128xbf16, #tpu.memory_space<vmem>>, vector<256x8xbf16>,
    %25 = vector.extract_strided_slice %6 {offsets = [2, 0, 0], sizes = [16, 16, 8], strides = [1, 1, 1]} : vector<18x18x8xbf16> to vector<16x16x8xbf16>
    %26 = vector.shape_cast %25 : vector<16x16x8xbf16> to vector<256x8xbf16>
    %c0_23 = arith.constant 0 : index
    %c48 = arith.constant 48 : index
    %27 = vector.load %arg9[%c0_23, %c48] : memref<256x128xbf16, #tpu.memory_space<vmem>>, vector<256x8xbf16>
    tpu.vector_store %arg9[%c0_23, %c48], %26 {strides = array<i32>} : memref<256x128xbf16, #tpu.memory_space<vmem>>, vector<256x8xbf16>,
    %28 = vector.extract_strided_slice %6 {offsets = [2, 1, 0], sizes = [16, 16, 8], strides = [1, 1, 1]} : vector<18x18x8xbf16> to vector<16x16x8xbf16>
    %29 = vector.shape_cast %28 : vector<16x16x8xbf16> to vector<256x8xbf16>
    %c0_24 = arith.constant 0 : index
    %c56 = arith.constant 56 : index
    %30 = vector.load %arg9[%c0_24, %c56] : memref<256x128xbf16, #tpu.memory_space<vmem>>, vector<256x8xbf16>
    tpu.vector_store %arg9[%c0_24, %c56], %29 {strides = array<i32>} : memref<256x128xbf16, #tpu.memory_space<vmem>>, vector<256x8xbf16>,
    %31 = vector.extract_strided_slice %6 {offsets = [2, 2, 0], sizes = [16, 16, 8], strides = [1, 1, 1]} : vector<18x18x8xbf16> to vector<16x16x8xbf16>
    %32 = vector.shape_cast %31 : vector<16x16x8xbf16> to vector<256x8xbf16>
    %c0_25 = arith.constant 0 : index
    %c64 = arith.constant 64 : index
    %33 = vector.load %arg9[%c0_25, %c64] : memref<256x128xbf16, #tpu.memory_space<vmem>>, vector<256x8xbf16>
    tpu.vector_store %arg9[%c0_25, %c64], %32 {strides = array<i32>} : memref<256x128xbf16, #tpu.memory_space<vmem>>, vector<256x8xbf16>,
    %cst = arith.constant 0.000000e+00 : bf16
    %34 = vector.broadcast %cst : bf16 to vector<256x56xbf16>
    %c0_26 = arith.constant 0 : index
    %c72 = arith.constant 72 : index
    %35 = vector.load %arg9[%c0_26, %c72] : memref<256x128xbf16, #tpu.memory_space<vmem>>, vector<256x56xbf16>
    tpu.vector_store %arg9[%c0_26, %c72], %34 {strides = array<i32>} : memref<256x128xbf16, #tpu.memory_space<vmem>>, vector<256x56xbf16>,
    %c0_27 = arith.constant 0 : index
    %c0_28 = arith.constant 0 : index
    %36 = vector.load %arg9[%c0_27, %c0_28] : memref<256x128xbf16, #tpu.memory_space<vmem>>, vector<256x128xbf16>
    %c0_29 = arith.constant 0 : index
    %c0_30 = arith.constant 0 : index
    %37 = vector.load %arg5[%c0_29, %c0_30] : memref<128x128xbf16, #tpu.memory_space<vmem>>, vector<128x128xbf16>
    %cst_31 = arith.constant dense<0.000000e+00> : vector<256x128xf32>
    %38 = tpu.matmul %36, %37, %cst_31 {dimension_numbers = #tpu.dot_dimension_numbers<[1], [0], [0], [1], [0, 0, 1, 1], [], []>} : vector<256x128xbf16>, vector<128x128xbf16>, vector<256x128xf32> -> vector<256x128xf32>
    %c0_32 = arith.constant 0 : index
    %c0_33 = arith.constant 0 : index
    %39 = vector.load %arg6[%c0_32, %c0_33] : memref<1x128xf32, #tpu.memory_space<vmem>>, vector<1x128xf32>
    %40 = vector.broadcast %39 : vector<1x128xf32> to vector<256x128xf32>
    %41 = arith.addf %38, %40 : vector<256x128xf32>
    %cst_34 = arith.constant 0.000000e+00 : f32
    %42 = vector.broadcast %cst_34 : f32 to vector<256x128xf32>
    %43 = arith.cmpf ogt, %41, %42 : vector<256x128xf32>
    %cst_35 = arith.constant 1.000000e-01 : f32
    %44 = vector.broadcast %cst_35 : f32 to vector<256x128xf32>
    %45 = arith.mulf %44, %41 : vector<256x128xf32>
    %46 = arith.select %43, %41, %45 : vector<256x128xi1>, vector<256x128xf32>
    %47 = vector.shape_cast %46 : vector<256x128xf32> to vector<16x16x128xf32>
    %c0_36 = arith.constant 0 : index
    %c0_37 = arith.constant 0 : index
    %c0_38 = arith.constant 0 : index
    %c0_39 = arith.constant 0 : index
    %48 = vector.load %arg7[%c0_36, %c0_37, %c0_38, %c0_39] : memref<1x16x16x128xf32, #tpu.memory_space<vmem>>, vector<1x16x16x128xf32>
    %49 = vector.shape_cast %48 : vector<1x16x16x128xf32> to vector<16x16x128xf32>
    %50 = vector.shape_cast %47 : vector<16x16x128xf32> to vector<1x16x16x128xf32>
    tpu.vector_store %arg7[%c0_36, %c0_37, %c0_38, %c0_39], %50 {strides = array<i32>} : memref<1x16x16x128xf32, #tpu.memory_space<vmem>>, vector<1x16x16x128xf32>,
    return
  }
  func.func @transform_0(%arg0: i32, %arg1: i32, %arg2: i32) -> (i32, i32, i32, i32) {
    %c0_i32 = arith.constant 0 : i32
    %c0_i32_0 = arith.constant 0 : i32
    %c0_i32_1 = arith.constant 0 : i32
    return %arg0, %arg1, %c0_i32, %c0_i32_0 : i32, i32, i32, i32
  }
  func.func @transform_1(%arg0: i32, %arg1: i32, %arg2: i32) -> (i32, i32, i32, i32) {
    %c0_i32 = arith.constant 0 : i32
    %c0_i32_0 = arith.constant 0 : i32
    %c0_i32_1 = arith.constant 0 : i32
    return %arg0, %arg1, %c0_i32, %c0_i32_0 : i32, i32, i32, i32
  }
  func.func @transform_2(%arg0: i32, %arg1: i32, %arg2: i32) -> (i32, i32) {
    %c0_i32 = arith.constant 0 : i32
    %c0_i32_0 = arith.constant 0 : i32
    return %c0_i32, %arg2 : i32, i32
  }
  func.func @transform_3(%arg0: i32, %arg1: i32, %arg2: i32) -> (i32, i32) {
    %c0_i32 = arith.constant 0 : i32
    %c0_i32_0 = arith.constant 0 : i32
    return %c0_i32, %arg2 : i32, i32
  }
  func.func @transform_4(%arg0: i32, %arg1: i32, %arg2: i32) -> (i32, i32, i32, i32) {
    %c0_i32 = arith.constant 0 : i32
    %c0_i32_0 = arith.constant 0 : i32
    return %arg0, %arg1, %c0_i32, %arg2 : i32, i32, i32, i32
  }
}

</mosaic_0001>

<bundles_post_ra>
// kernel: tpu_custom_call.1
= control target key start
LH: loop header
LB: loop body
LE: loop exit
PB: predicated region body
PF: predicated region fallthrough
CT: control target
= control target key end

     0   :  { %9 = vsyncpa [#allocation5], 0  ;;  %s4120_s0 = inlined_call_operand.vmem [shape: bf16[2,18,18,8], index: 0, kind: input, shape index: {}]   ;;  %s4121_s1 = inlined_call_operand.vmem [shape: bf16[2,2,18,8], index: 1, kind: input, shape index: {}]   ;;  %s4122_s2 = inlined_call_operand.vmem [shape: bf16[128,128], index: 2, kind: input, shape index: {}]   ;;  %s4123_s3 = inlined_call_operand.vmem [shape: f32[1,128], index: 3, kind: input, shape index: {}]   ;;  %s4124_s4 = inlined_call_operand.hbm [shape: f32[2,16,16,128], index: 4, kind: output, shape index: {}]  }
   0x1   :  { %11 = vsyncpa [#allocation5 + $0x1], 0  ;;  %s2770_s15 = smov 0   ;;  %s2772_s16 = smov 0  }
   0x2   :  { %s2774_s17 = smov 0   ;;  %s2776_s18 = smov 0  }
   0x3   :  { %s2778_s19 = smov 0   ;;  %s2780_s20 = smov 0  }
   0x4 LB: > { %s2378_s21 = sadd.s32 4294967295, %s2732_s20   ;;  %s2379_s22 = sadd.s32 4294967294, %s2732_s20   ;;  %s2732_s20 = sphi %s2780_s20, %s17_s20   ;;  %s2728_s19 = sphi %s2778_s19, %s4170_s19   ;;  %s2724_s18 = sphi %s2776_s18, %s4169_s18   ;;  %s2720_s17 = sphi %s2774_s17, %s4168_s17   ;;  %s2716_s16 = sphi %s2772_s16, %s4167_s16   ;;  %s2712_s15 = sphi %s2770_s15, %s4166_s15  }
   0x5   : > { %s36_s23 = sadd.s32 1, %s2728_s19  ;;  %s155_s24 = sadd.s32 1, %s2720_s17 }
   0x6   : > { %p38_p0 = scmp.ge.s32.totalorder %s36_s23, 2  ;;  %p165_p1 = scmp.ne.s32.totalorder %s2720_s17, %s2716_s16 }
   0x7   : > { %p166_p2 = scmp.eq.s32.totalorder %s2378_s21, 1  ;;  %p171_p3 = scmp.ne.s32.totalorder %s2716_s16, %s2712_s15 }
   0x8   : > { %s4172_s23 = smov (%p38_p0, %s36_s23), 0  ;;  %p172_p5 = scmp.eq.s32.totalorder %s2379_s22, 1 }
   0x9   : > { %p2810_p4 = por %p166_p2, %p165_p1  ;;  %s148_s26 = ssub.s32 %s2728_s19, %s4172_s23 }
   0xa   : > { %p2384_p6 = scmp.ge.s32.totalorder %s2732_s20, 1  ;;  %p153_p7 = scmp.eq.s32.totalorder %s148_s26, 0 }
   0xb   : > { %p2817_p8 = por %p172_p5, %p171_p3  ;;  %p241_p9 = scmp.lt.s32.totalorder %s2732_s20, 3 }
   0xc   : > { %s2823_s28 = scalar_select %p153_p7, %s2720_s17, %s155_s24  }
   0xd   : > { %p242_p10 = pnand %p2384_p6, %p241_p9 }
   0xf   : > { %245 = sbr.rel (%p242_p10) target bundleno = 673 (0x2a1), region = 36 }
  0x16   : > { %p300_p11 = scmp.lt.s32.totalorder %s2724_s18, 1  ;;  %vm383_vm0 = vcmask 60416   ;;  %vm386_vm1 = vcmask 57344   ;;  %vm596_vm2 = vcmask 64512   ;;  %vm1129_vm3 = vcmask 1042432   ;;  %s2734_s8 = smov 24  }
  0x17   : > { %vm1130_vm4 = vcmask 1046532   ;;  %vm613_vm5 = vsmask.f32 3328  ;;  %vm614_vm6 = vsmask.f32 7440  ;;  %s2735_s9 = smov 16  }
  0x18   : > { %s2827_s29 = scalar_select %p300_p11, %s2724_s18, 1  ;;  %vm2944_vm7 = vmor %vm1129_vm3, %vm1130_vm4  ;;  %vm1096_vm9 = vcmask 130112   ;;  %vm1340_vm10 = vcmask 195712   ;;  %vm1410_vm11 = vcmask 261312   ;;  %vm1502_vm12 = vcmask 326912  }
  0x19   : > { %vm2986_vm8 = vmor %vm613_vm5, %vm614_vm6  ;;  %s2736_s10 = smov 8   ;;  %s2737_s11 = smov 32   ;;  %vm1578_vm13 = vcmask 392512   ;;  %vm1648_vm14 = vcmask 458112   ;;  %vm1740_vm15 = vcmask 523712  }
  0x1a   : > { %s2563_s30 = smul.u32 216, %s2827_s29  ;;  %s2738_s12 = smov 40  }
  0x1b   : > { %s2739_s13 = smov 48   ;;  %s2740_s14 = smov 56  }
  0x1c   : > { %s2833_s7 = scalar_lea.vmem %s4120_s0, %s2563_s30  ;;  %s2741_s21 = smov 64  }
  0x1d   : > { %v362_v0 = vld [vmem:[%s2833_s7 + $0x6c] sm:$0xf]  ;;  %v363_v1 = vld [vmem:[%s2833_s7 + $0x70] sm:$0xf]  ;;  %v365_v4 = vld [vmem:[%s2833_s7 + $0x78] sm:$0xf] }
  0x1e   : > { %v338_v2 = vld [vmem:[%s2833_s7 + $0xc] sm:$0xf]  ;;  %412 = vst.msk [vmem:[#allocation2 + $0x6c] sm:$0xf] %vm383_vm0, %v362_v0  ;;  %413 = vst.msk [vmem:[#allocation2 + $0x70] sm:$0xf] %vm383_vm0, %v363_v1 }
  0x1f   : > { %v339_v3 = vld [vmem:[%s2833_s7 + $0x10] sm:$0xf]  ;;  %388 = vst.msk [vmem:[#allocation2 + $0xc] sm:$0xf] %vm383_vm0, %v338_v2  ;;  %v366_v5 = vld [vmem:[%s2833_s7 + $0x7c] sm:$0xf] }
  0x20   : > { %389 = vst.msk [vmem:[#allocation2 + $0x10] sm:$0xf] %vm383_vm0, %v339_v3  ;;  %415 = vst.msk [vmem:[#allocation2 + $0x78] sm:$0xf] %vm383_vm0, %v365_v4  ;;  %v341_v6 = vld [vmem:[%s2833_s7 + $0x18] sm:$0xf] }
  0x21   : > { %416 = vst.msk [vmem:[#allocation2 + $0x7c] sm:$0xf] %vm383_vm0, %v366_v5  ;;  %v342_v7 = vld [vmem:[%s2833_s7 + $0x1c] sm:$0xf]  ;;  %v359_v8 = vld [vmem:[%s2833_s7 + $0x60] sm:$0xf] }
  0x22   : > { %391 = vst.msk [vmem:[#allocation2 + $0x18] sm:$0xf] %vm383_vm0, %v341_v6  ;;  %392 = vst.msk [vmem:[#allocation2 + $0x1c] sm:$0xf] %vm383_vm0, %v342_v7  ;;  %v360_v9 = vld [vmem:[%s2833_s7 + $0x64] sm:$0xf] }
  0x23   : > { %v361_v10 = vld [vmem:[%s2833_s7 + $0x68] sm:$0x1]  ;;  %409 = vst.msk [vmem:[#allocation2 + $0x60] sm:$0xf] %vm383_vm0, %v359_v8  ;;  %v335_v11 = vld [vmem:[%s2833_s7] sm:$0xf] }
  0x24   : > { %410 = vst.msk [vmem:[#allocation2 + $0x64] sm:$0xf] %vm383_vm0, %v360_v9  ;;  %v336_v12 = vld [vmem:[%s2833_s7 + $0x4] sm:$0xf]  ;;  %v337_v13 = vld [vmem:[%s2833_s7 + $0x8] sm:$0x1] }
  0x25   : > { %411 = vst.msk [vmem:[#allocation2 + $0x68] sm:$0x1] %vm386_vm1, %v361_v10  ;;  %v364_v14 = vld [vmem:[%s2833_s7 + $0x74] sm:$0x1]  ;;  %387 = vst.msk [vmem:[#allocation2 + $0x8] sm:$0x1] %vm386_vm1, %v337_v13 }
  0x26   : > { %384 = vst.msk [vmem:[#allocation2] sm:$0xf] %vm383_vm0, %v335_v11  ;;  %385 = vst.msk [vmem:[#allocation2 + $0x4] sm:$0xf] %vm383_vm0, %v336_v12  ;;  %v340_v15 = vld [vmem:[%s2833_s7 + $0x14] sm:$0x1] }
  0x27   : > { %414 = vst.msk [vmem:[#allocation2 + $0x74] sm:$0x1] %vm386_vm1, %v364_v14  ;;  %v367_v16 = vld [vmem:[%s2833_s7 + $0x80] sm:$0x1]  ;;  %390 = vst.msk [vmem:[#allocation2 + $0x14] sm:$0x1] %vm386_vm1, %v340_v15 }
  0x28   : > { %v343_v17 = vld [vmem:[%s2833_s7 + $0x20] sm:$0x1]  ;;  %417 = vst.msk [vmem:[#allocation2 + $0x80] sm:$0x1] %vm386_vm1, %v367_v16  ;;  %v368_v18 = vld [vmem:[%s2833_s7 + $0x84] sm:$0xf] }
  0x29   : > { %393 = vst.msk [vmem:[#allocation2 + $0x20] sm:$0x1] %vm386_vm1, %v343_v17  ;;  %v369_v19 = vld [vmem:[%s2833_s7 + $0x88] sm:$0xf]  ;;  %v344_v20 = vld [vmem:[%s2833_s7 + $0x24] sm:$0xf] }
  0x2a   : > { %418 = vst.msk [vmem:[#allocation2 + $0x84] sm:$0xf] %vm383_vm0, %v368_v18  ;;  %419 = vst.msk [vmem:[#allocation2 + $0x88] sm:$0xf] %vm383_vm0, %v369_v19  ;;  %v345_v21 = vld [vmem:[%s2833_s7 + $0x28] sm:$0xf] }
  0x2b   : > { %394 = vst.msk [vmem:[#allocation2 + $0x24] sm:$0xf] %vm383_vm0, %v344_v20  ;;  %v370_v22 = vld [vmem:[%s2833_s7 + $0x8c] sm:$0x1]  ;;  %v2882_v25 = vld [vmem:[#allocation2 + $0x70] sm:$0xf] }
  0x2c   : > { %v346_v23 = vld [vmem:[%s2833_s7 + $0x2c] sm:$0x1]  ;;  %395 = vst.msk [vmem:[#allocation2 + $0x28] sm:$0xf] %vm383_vm0, %v345_v21  ;;  %v846_v30 = vshrl.u32 %v2882_v25, 16  ;;  %v1197_v51 = vrot.slane %v2882_v25, 5 }
  0x2d   : > { %v2880_v24 = vld [vmem:[#allocation2 + $0x6c] sm:$0xf]  ;;  %420 = vst.msk [vmem:[#allocation2 + $0x8c] sm:$0x1] %vm386_vm1, %v370_v22  ;;  %396 = vst.msk [vmem:[#allocation2 + $0x2c] sm:$0x1] %vm386_vm1, %v346_v23 }
  0x2e   : > { %v2884_v26 = vld [vmem:[#allocation2 + $0xc] sm:$0xf]  ;;  %v2891_v27 = vcombine.low %v2880_v24, %v2882_v25  ;;  %v833_v28 = vshrl.u32 %v2880_v24, 16  ;;  %v836_v29 = vshll.u32 %v2880_v24, 16  ;;  %v2896_v31 = vld [vmem:[#allocation2 + $0x10] sm:$0xf] }
  0x2f   : > { %v2389_v32 = vcombine.low %v2884_v26, %v2896_v31  ;;  %v641_v33 = vshrl.u32 %v2884_v26, 16  ;;  %v644_v34 = vshll.u32 %v2884_v26, 16  ;;  %v650_v35 = vshll.u32 %v2896_v31, 16  ;;  %v2903_v36 = vld [vmem:[#allocation2 + $0x78] sm:$0xf]  ;;  %s2564_s22 = smul.u32 24, %s2827_s29 }
  0x30   : > { %4138 = vst [vmem:[#allocation7_spill] sm:$0xff] %v2891_v27  ;;  %1378 = vrot.lane.b32.xlu1 %v2891_v27, %s2734_s8  ;;  %v654_v37 = vshrl.u32 %v2896_v31, 16  ;;  %606 = vst.msk [vmem:[#allocation3 + $0x48] sm:$0xff] %vm596_vm2, %v2891_v27  ;;  %v2910_v38 = vld [vmem:[#allocation2 + $0x7c] sm:$0xf]  ;;  %v857_v39 = vshrl.u32 %v2903_v36, 16 }
  0x31   : > { %v860_v40 = vshll.u32 %v2903_v36, 16  ;;  %v2429_v41 = vrot.slane %v2880_v24, 9  ;;  %v643_v42 = vrot.slane %v641_v33, 4  ;;  %v646_v43 = vrot.slane %v644_v34, 5  ;;  %1362 = vrot.lane.b32.xlu0 %v2389_v32, %s2734_s8  ;;  %598 = vst.msk [vmem:[#allocation3 + $0x8] sm:$0xff] %vm596_vm2, %v2389_v32  ;;  %s3438_s29 = scalar_lea.vmem %s4121_s1, %s2564_s22 }
  0x32   : > { %v2919_v44 = vcombine.low %v2903_v36, %v2910_v38  ;;  %v870_v45 = vshrl.u32 %v2910_v38, 16  ;;  %v2922_v46 = vld [vmem:[#allocation2 + $0x18] sm:$0xf]  ;;  %v2924_v47 = vrot.slane %v654_v37, 4  ;;  %v2926_v48 = vld [vmem:[#allocation2 + $0x1c] sm:$0xf] }
  0x33   : > { %v665_v49 = vshrl.u32 %v2922_v46, 16  ;;  %v668_v50 = vshll.u32 %v2922_v46, 16  ;;  %v2935_v52 = vcombine.low %v2922_v46, %v2926_v48  ;;  %v678_v53 = vshrl.u32 %v2926_v48, 16  ;;  %v2938_v54 = vld [vmem:[#allocation2 + $0x60] sm:$0xf] }
  0x34   : > { %607 = vst.msk [vmem:[#allocation3 + $0x50] sm:$0xff] %vm596_vm2, %v2919_v44  ;;  %v2940_v55 = vld [vmem:[#allocation2 + $0x64] sm:$0xf]  ;;  %v2421_v57 = vrot.slane %v2884_v26, 9  ;;  %v647_v58 = vor.u32 %v646_v43, %v643_v42  ;;  %1380 = vrot.lane.b32.xlu1 %v2919_v44, %s2734_s8  ;;  %v2951_v59 = vld [vmem:[#allocation2 + $0x68] sm:$0x1]  ;;  %v1198_v3 = vsel %vm2944_vm7, %v2429_v41, %v1197_v51 }
  0x35   : > { %v2428_v60 = vrot.slane %v2938_v54, 9  ;;  %v1190_v61 = vrot.slane %v2940_v55, 5  ;;  %v2955_v62 = vld [vmem:[#allocation2] sm:$0xf]  ;;  %1364 = vrot.lane.b32.xlu0 %v2935_v52, %s2734_s8  ;;  %599 = vst.msk [vmem:[#allocation3 + $0x10] sm:$0xff] %vm596_vm2, %v2935_v52  ;;  %v1193_v63 = vrot.slane %v2951_v59, 5 }
  0x36   : > { %v2962_v0 = vld [vmem:[#allocation2 + $0x4] sm:$0xf]  ;;  %v448_v1 = vld [vmem:[#allocation2 + $0x8] sm:$0x1]  ;;  %v2420_v2 = vrot.slane %v2955_v62, 9  ;;  %v1199_v9 = vrot.slane %v1197_v51, 4 }
  0x37   : > { %v1191_v4 = vsel %vm2944_vm7, %v2428_v60, %v1190_v61  ;;  %v1192_v5 = vrot.slane %v1190_v61, 4  ;;  %v1134_v6 = vrot.slane %v2962_v0, 5  ;;  %v1137_v7 = vrot.slane %v448_v1, 5  ;;  %v2970_v8 = vld [vmem:[#allocation2 + $0x74] sm:$0x1] }
  0x38   : > { %v1200_v10 = vrot.slane %v2970_v8, 5  ;;  %v451_v11 = vld [vmem:[#allocation2 + $0x14] sm:$0x1]  ;;  %v1141_v12 = vrot.slane %v2896_v31, 5  ;;  %v648_v13 = vrot.slane %v647_v58, 4  ;;  %v652_v32 = vrot.slane %v650_v35, 5 }
  0x39   : > { %v1194_v14 = vsel %vm2944_vm7, %v1192_v5, %v1193_v63  ;;  %v1135_v15 = vsel %vm2944_vm7, %v2420_v2, %v1134_v6  ;;  %v1136_v16 = vrot.slane %v1134_v6, 4  ;;  %v1144_v17 = vrot.slane %v451_v11, 5  ;;  %v372_v58 = vld [vmem:[%s2833_s7 + $0x94] sm:$0xf] }
  0x3a   : > { %v2978_v18 = vcombine.low %v1191_v4, %v1194_v14  ;;  %v1201_v19 = vsel %vm2944_vm7, %v1199_v9, %v1200_v10  ;;  %v1142_v20 = vsel %vm2944_vm7, %v2421_v57, %v1141_v12  ;;  %v1143_v21 = vrot.slane %v1141_v12, 4  ;;  %v371_v57 = vld [vmem:[%s2833_s7 + $0x90] sm:$0xf]  ;;  %422 = vst.msk [vmem:[#allocation2 + $0x94] sm:$0xf] %vm383_vm0, %v372_v58 }
  0x3b   : > { %v1138_v23 = vsel %vm2944_vm7, %v1136_v16, %v1137_v7  ;;  %v2992_v26 = vcombine.low %v1198_v3, %v1201_v19  ;;  %v660_v33 = vshll.u32 %v451_v11, 16  ;;  %v617_v41 = vshrl.u32 %v2955_v62, 16  ;;  %421 = vst.msk [vmem:[#allocation2 + $0x90] sm:$0xf] %vm383_vm0, %v371_v57  ;;  %v347_v3 = vld [vmem:[%s2833_s7 + $0x30] sm:$0xf] }
  0x3c   : > { %4141 = vst [vmem:[#allocation8_spill] sm:$0xff] %v2978_v18  ;;  %1308 = vrot.lane.b32.xlu1 %v2978_v18, %s2735_s9  ;;  %v2436_v34 = vcombine.low %v1135_v15, %v1138_v23  ;;  %v1145_v37 = vsel %vm2944_vm7, %v1143_v21, %v1144_v17  ;;  %v620_v42 = vshll.u32 %v2955_v62, 16  ;;  %v653_v31 = vsel %vm2986_vm8, %v648_v13, %v652_v32  ;;  %v348_v7 = vld [vmem:[%s2833_s7 + $0x34] sm:$0xf]  ;;  %v349_v14 = vld [vmem:[%s2833_s7 + $0x38] sm:$0x1] }
  0x3d   : > { %4144 = vst [vmem:[#allocation9_spill] sm:$0xff] %v2992_v26  ;;  %v3002_v43 = vcombine.low %v1142_v20, %v1145_v37  ;;  %v657_v35 = vor.u32 %v2924_v47, %v652_v32  ;;  %v662_v51 = vrot.slane %v660_v33, 5  ;;  %v619_v60 = vrot.slane %v617_v41, 4  ;;  %397 = vst.msk [vmem:[#allocation2 + $0x30] sm:$0xf] %vm383_vm0, %v347_v3 }
  0x3e   : > { %1292 = vrot.lane.b32.xlu0 %v2436_v34, %s2735_s9  ;;  %v622_v61 = vrot.slane %v620_v42, 5  ;;  %v626_v63 = vshll.u32 %v2962_v0, 16  ;;  %v630_v2 = vshrl.u32 %v2962_v0, 16  ;;  %v636_v47 = vshll.u32 %v448_v1, 16  ;;  %398 = vst.msk [vmem:[#allocation2 + $0x34] sm:$0xf] %vm383_vm0, %v348_v7 }
  0x3f   : > { %v658_v4 = vrot.slane %v657_v35, 4  ;;  %v835_v5 = vrot.slane %v833_v28, 4  ;;  %v838_v6 = vrot.slane %v836_v29, 5  ;;  %v842_v12 = vshll.u32 %v2882_v25, 16  ;;  %v373_v28 = vld [vmem:[%s2833_s7 + $0x98] sm:$0x1] }
  0x40   : > { %1310 = vrot.lane.b32.xlu1 %v2992_v26, %s2735_s9  ;;  %v623_v9 = vor.u32 %v622_v61, %v619_v60  ;;  %v628_v10 = vrot.slane %v626_v63, 5  ;;  %v632_v11 = vrot.slane %v630_v2, 4  ;;  %v638_v29 = vrot.slane %v636_v47, 5  ;;  %423 = vst.msk [vmem:[#allocation2 + $0x98] sm:$0x1] %vm386_vm1, %v373_v28 }
  0x41   : > { %v663_v24 = vsel %vm2986_vm8, %v658_v4, %v662_v51  ;;  %v839_v1 = vor.u32 %v838_v6, %v835_v5  ;;  %v848_v13 = vrot.slane %v846_v30, 4  ;;  %v374_v15 = vld [vmem:[%s2833_s7 + $0x9c] sm:$0xf]  ;;  %v844_v20 = vrot.slane %v842_v12, 5  ;;  %399 = vst.msk [vmem:[#allocation2 + $0x38] sm:$0x1] %vm386_vm1, %v349_v14 }
  0x42   : > { %1294 = vrot.lane.b32.xlu0 %v3002_v43, %s2735_s9  ;;  %v3035_v16 = vcombine.low %v653_v31, %v663_v24  ;;  %v624_v17 = vrot.slane %v623_v9, 4  ;;  %v633_v19 = vor.u32 %v632_v11, %v628_v10  ;;  %v375_v21 = vld [vmem:[%s2833_s7 + $0xa0] sm:$0xf]  ;;  %424 = vst.msk [vmem:[#allocation2 + $0x9c] sm:$0xf] %vm383_vm0, %v374_v15  ;;  %v852_v23 = vshll.u32 %v2970_v8, 16 }
  0x43   : > { %v350_v25 = vld [vmem:[%s2833_s7 + $0x3c] sm:$0xf]  ;;  %v840_v30 = vrot.slane %v839_v1, 4  ;;  %v809_v32 = vshrl.u32 %v2938_v54, 16  ;;  %v812_v33 = vshll.u32 %v2938_v54, 16  ;;  %v849_v42 = vor.u32 %v848_v13, %v844_v20 }
  0x44   : > { %425 = vst.msk [vmem:[#allocation2 + $0xa0] sm:$0xf] %vm383_vm0, %v375_v21  ;;  %v351_v34 = vld [vmem:[%s2833_s7 + $0x40] sm:$0xf]  ;;  %400 = vst.msk [vmem:[#allocation2 + $0x3c] sm:$0xf] %vm383_vm0, %v350_v25  ;;  %1050 = vrot.lane.b32.xlu1 %v3035_v16, %s2736_s10  ;;  %v629_v37 = vsel %vm2986_vm8, %v624_v17, %v628_v10 }
  0x45   : > { %v634_v41 = vrot.slane %v633_v19, 4  ;;  %v818_v8 = vshll.u32 %v2940_v55, 16  ;;  %401 = vst.msk [vmem:[#allocation2 + $0x40] sm:$0xf] %vm383_vm0, %v351_v34  ;;  %v376_v31 = vld [vmem:[%s2833_s7 + $0xa4] sm:$0x1]  ;;  %v845_v51 = vsel %vm2986_vm8, %v840_v30, %v844_v20 }
  0x46   : > { %v352_v35 = vld [vmem:[%s2833_s7 + $0x44] sm:$0x1]  ;;  %v854_v57 = vrot.slane %v852_v23, 5  ;;  %v811_v58 = vrot.slane %v809_v32, 4  ;;  %v814_v60 = vrot.slane %v812_v33, 5  ;;  %v850_v63 = vrot.slane %v849_v42, 4 }
  0x47   : > { %426 = vst.msk [vmem:[#allocation2 + $0xa4] sm:$0x1] %vm386_vm1, %v376_v31  ;;  %402 = vst.msk [vmem:[#allocation2 + $0x44] sm:$0x1] %vm386_vm1, %v352_v35  ;;  %v639_v61 = vsel %vm2986_vm8, %v634_v41, %v638_v29  ;;  %v820_v2 = vrot.slane %v818_v8, 5  ;;  %v822_v3 = vshrl.u32 %v2940_v55, 16 }
  0x48   : > { %v2404_v4 = vcombine.low %v629_v37, %v639_v61  ;;  %v815_v47 = vor.u32 %v814_v60, %v811_v58  ;;  %v828_v5 = vshll.u32 %v2951_v59, 16  ;;  %v3063_v6 = vld [vmem:[#allocation2 + $0x80] sm:$0x1]  ;;  %v859_v7 = vrot.slane %v857_v39, 4  ;;  %v3098_v42 = vld [vmem:[#allocation2 + $0x88] sm:$0xf] }
  0x49   : > { %v855_v9 = vsel %vm2986_vm8, %v850_v63, %v854_v57  ;;  %v824_v10 = vrot.slane %v822_v3, 4  ;;  %v862_v11 = vrot.slane %v860_v40, 5  ;;  %v866_v12 = vshll.u32 %v2910_v38, 16  ;;  %v3078_v15 = vld [vmem:[#allocation2 + $0x20] sm:$0x1] }
  0x4a   : > { %1048 = vrot.lane.b32.xlu0 %v2404_v4, %s2736_s10  ;;  %v3073_v28 = vcombine.low %v845_v51, %v855_v9  ;;  %v816_v24 = vrot.slane %v815_v47, 4  ;;  %v830_v59 = vrot.slane %v828_v5, 5  ;;  %v872_v29 = vrot.slane %v870_v45, 4  ;;  %v377_v8 = vld [vmem:[%s2833_s7 + $0xa8] sm:$0xf] }
  0x4b   : > { %v825_v1 = vor.u32 %v824_v10, %v820_v2  ;;  %v863_v39 = vor.u32 %v862_v11, %v859_v7  ;;  %v868_v13 = vrot.slane %v866_v12, 5  ;;  %v876_v14 = vshll.u32 %v3063_v6, 16  ;;  %v378_v57 = vld [vmem:[%s2833_s7 + $0xac] sm:$0xf]  ;;  %427 = vst.msk [vmem:[#allocation2 + $0xa8] sm:$0xf] %vm383_vm0, %v377_v8 }
  0x4c   : > { %4145 = vst [vmem:[#allocation10_spill] sm:$0xff] %v3073_v28  ;;  %1066 = vrot.lane.b32.xlu1 %v3073_v28, %s2736_s10  ;;  %v821_v40 = vsel %vm2986_vm8, %v816_v24, %v820_v2  ;;  %v667_v17 = vrot.slane %v665_v49, 4  ;;  %v670_v45 = vrot.slane %v668_v50, 5  ;;  %v674_v19 = vshll.u32 %v2926_v48, 16  ;;  %v3092_v49 = vld [vmem:[#allocation2 + $0x84] sm:$0xf] }
  0x4d   : > { %v826_v20 = vrot.slane %v825_v1, 4  ;;  %v864_v21 = vrot.slane %v863_v39, 4  ;;  %v873_v25 = vor.u32 %v872_v29, %v868_v13  ;;  %v878_v30 = vrot.slane %v876_v14, 5  ;;  %v353_v58 = vld [vmem:[%s2833_s7 + $0x48] sm:$0xf] }
  0x4e   : > { %v671_v23 = vor.u32 %v670_v45, %v667_v17  ;;  %v676_v32 = vrot.slane %v674_v19, 5  ;;  %v680_v33 = vrot.slane %v678_v53, 4  ;;  %v684_v34 = vshll.u32 %v3078_v15, 16  ;;  %v3113_v3 = vld [vmem:[#allocation2 + $0x24] sm:$0xf] }
  0x4f   : > { %v831_v50 = vsel %vm2986_vm8, %v826_v20, %v830_v59  ;;  %v869_v37 = vsel %vm2986_vm8, %v864_v21, %v868_v13  ;;  %v874_v41 = vrot.slane %v873_v25, 4  ;;  %v2430_v61 = vrot.slane %v2903_v36, 9  ;;  %v3115_v4 = vld [vmem:[#allocation2 + $0x28] sm:$0xf]  ;;  %428 = vst.msk [vmem:[#allocation2 + $0xac] sm:$0xf] %vm383_vm0, %v378_v57 }
  0x50   : > { %v3101_v31 = vcombine.low %v821_v40, %v831_v50  ;;  %1470 = vrot.lane.b32.xlu1 %v3073_v28, %s2737_s11  ;;  %v672_v53 = vrot.slane %v671_v23, 4  ;;  %v681_v35 = vor.u32 %v680_v33, %v676_v32  ;;  %v686_v51 = vrot.slane %v684_v34, 5  ;;  %v354_v47 = vld [vmem:[%s2833_s7 + $0x4c] sm:$0xf]  ;;  %403 = vst.msk [vmem:[#allocation2 + $0x48] sm:$0xf] %vm383_vm0, %v353_v58 }
  0x51   : > { %v879_v60 = vsel %vm2986_vm8, %v874_v41, %v878_v30  ;;  %v1204_v63 = vrot.slane %v2910_v38, 5  ;;  %v1207_v2 = vrot.slane %v3063_v6, 5  ;;  %404 = vst.msk [vmem:[#allocation2 + $0x4c] sm:$0xf] %vm383_vm0, %v354_v47  ;;  %v379_v36 = vld [vmem:[%s2833_s7 + $0xb0] sm:$0x1]  ;;  %v3132_v11 = vcombine.low %v3092_v49, %v3098_v42 }
  0x52   : > { %4146 = vst [vmem:[#allocation11_spill] sm:$0xff] %v3101_v31  ;;  %1064 = vrot.lane.b32.xlu0 %v3101_v31, %s2736_s10  ;;  %v3122_v5 = vcombine.low %v869_v37, %v879_v60  ;;  %v682_v7 = vrot.slane %v681_v35, 4  ;;  %v355_v38 = vld [vmem:[%s2833_s7 + $0x50] sm:$0x1]  ;;  %v677_v6 = vsel %vm2986_vm8, %v672_v53, %v676_v32  ;;  %v1148_v10 = vrot.slane %v2926_v48, 5 }
  0x53   : > { %v1206_v9 = vrot.slane %v1204_v63, 4  ;;  %429 = vst.msk [vmem:[#allocation2 + $0xb0] sm:$0x1] %vm386_vm1, %v379_v36  ;;  %405 = vst.msk [vmem:[#allocation2 + $0x50] sm:$0x1] %vm386_vm1, %v355_v38  ;;  %v881_v24 = vshrl.u32 %v3092_v49, 16  ;;  %v1205_v59 = vsel %vm2944_vm7, %v2430_v61, %v1204_v63  ;;  %v3155_v13 = vcombine.low %v3113_v3, %v3115_v4 }
  0x54   : > { %1472 = vrot.lane.b32.xlu1 %v3122_v5, %s2737_s11  ;;  %v687_v12 = vsel %vm2986_vm8, %v682_v7, %v686_v51  ;;  %v884_v29 = vshll.u32 %v3092_v49, 16  ;;  %v894_v1 = vshrl.u32 %v3098_v42, 16  ;;  %608 = vst.msk [vmem:[#allocation3 + $0x58] sm:$0xff] %vm596_vm2, %v3132_v11  ;;  %v2422_v14 = vrot.slane %v2922_v46, 9  ;;  %v3170_v25 = vld [vmem:[#allocation2 + $0x8c] sm:$0x1] }
  0x55   : > { %v1208_v48 = vsel %vm2944_vm7, %v1206_v9, %v1207_v2  ;;  %v3151_v39 = vcombine.low %v677_v6, %v687_v12  ;;  %v1150_v40 = vrot.slane %v1148_v10, 4  ;;  %v1151_v17 = vrot.slane %v3078_v15, 5  ;;  %600 = vst.msk [vmem:[#allocation3 + $0x18] sm:$0xff] %vm596_vm2, %v3155_v13  ;;  %v3181_v8 = vld [vmem:[#allocation2 + $0x90] sm:$0xf] }
  0x56   : > { %1454 = vrot.lane.b32.xlu0 %v3035_v16, %s2737_s11  ;;  %v3161_v45 = vcombine.low %v1205_v59, %v1208_v48  ;;  %v890_v16 = vshll.u32 %v3098_v42, 16  ;;  %v883_v19 = vrot.slane %v881_v24, 4  ;;  %v886_v20 = vrot.slane %v884_v29, 5  ;;  %v3187_v35 = vld [vmem:[#allocation2 + $0x2c] sm:$0x1]  ;;  %v4164_v56 = vld [vmem:[#allocation10_spill] sm:$0xff] }
  0x57   : > { %v896_v21 = vrot.slane %v894_v1, 4  ;;  %v689_v46 = vshrl.u32 %v3113_v3, 16  ;;  %v692_v15 = vshll.u32 %v3113_v3, 16  ;;  %v1149_v23 = vsel %vm2944_vm7, %v2422_v14, %v1148_v10  ;;  %v3189_v58 = vld [vmem:[#allocation2 + $0x94] sm:$0xf] }
  0x58   : > { %1546 = vrot.lane.b32.xlu1 %v2992_v26, %s2738_s12  ;;  %v892_v30 = vrot.slane %v890_v16, 5  ;;  %v1152_v32 = vsel %vm2944_vm7, %v1150_v40, %v1151_v17  ;;  %v702_v33 = vshrl.u32 %v3115_v4, 16  ;;  %v698_v34 = vshll.u32 %v3115_v4, 16  ;;  %v380_v60 = vld [vmem:[%s2833_s7 + $0xb4] sm:$0xf] }
  0x59   : > { %v887_v50 = vor.u32 %v886_v20, %v883_v19  ;;  %v900_v41 = vshll.u32 %v3170_v25, 16  ;;  %v3185_v53 = vcombine.low %v1149_v23, %v1152_v32  ;;  %v691_v51 = vrot.slane %v689_v46, 4  ;;  %v381_v2 = vld [vmem:[%s2833_s7 + $0xb8] sm:$0xf]  ;;  %430 = vst.msk [vmem:[#allocation2 + $0xb4] sm:$0xf] %vm383_vm0, %v380_v60 }
  0x5a   : > { %1456 = vrot.lane.b32.xlu0 %v3151_v39, %s2737_s11  ;;  %v897_v37 = vor.u32 %v896_v21, %v892_v30  ;;  %v694_v57 = vrot.slane %v692_v15, 5  ;;  %v3192_v61 = vrot.slane %v698_v34, 5  ;;  %v704_v63 = vrot.slane %v702_v33, 4  ;;  %v356_v47 = vld [vmem:[%s2833_s7 + $0x54] sm:$0xf] }
  0x5b   : > { %v3201_v7 = vld [vmem:[#allocation2 + $0x34] sm:$0xf]  ;;  %431 = vst.msk [vmem:[#allocation2 + $0xb8] sm:$0xf] %vm383_vm0, %v381_v2  ;;  %v357_v36 = vld [vmem:[%s2833_s7 + $0x58] sm:$0xf]  ;;  %v3208_v10 = vcombine.low %v3181_v8, %v3189_v58 }
  0x5c   : > { %1548 = vrot.lane.b32.xlu1 %v3161_v45, %s2738_s12  ;;  %406 = vst.msk [vmem:[#allocation2 + $0x54] sm:$0xf] %vm383_vm0, %v356_v47  ;;  %v888_v38 = vrot.slane %v887_v50, 4  ;;  %v898_v6 = vrot.slane %v897_v37, 4  ;;  %v902_v9 = vrot.slane %v900_v41, 5  ;;  %v695_v24 = vor.u32 %v694_v57, %v691_v51 }
  0x5d   : > { %407 = vst.msk [vmem:[#allocation2 + $0x58] sm:$0xf] %vm383_vm0, %v357_v36  ;;  %v358_v12 = vld [vmem:[%s2833_s7 + $0x5c] sm:$0x1]  ;;  %v705_v59 = vor.u32 %v704_v63, %v3192_v61  ;;  %v708_v48 = vshll.u32 %v3187_v35, 16  ;;  %v1211_v40 = vrot.slane %v3098_v42, 5 }
  0x5e   : > { %1530 = vrot.lane.b32.xlu0 %v3002_v43, %s2738_s12  ;;  %v3199_v43 = vld [vmem:[#allocation2 + $0x30] sm:$0xf]  ;;  %609 = vst.msk [vmem:[#allocation3 + $0x60] sm:$0xff] %vm596_vm2, %v3208_v10  ;;  %v893_v1 = vsel %vm2986_vm8, %v888_v38, %v892_v30  ;;  %v903_v14 = vsel %vm2986_vm8, %v898_v6, %v902_v9  ;;  %v696_v17 = vrot.slane %v695_v24, 4  ;;  %v1155_v21 = vrot.slane %v3115_v4, 5 }
  0x5f   : > { %v3221_v29 = vcombine.low %v3199_v43, %v3201_v7  ;;  %408 = vst.msk [vmem:[#allocation2 + $0x5c] sm:$0x1] %vm386_vm1, %v358_v12  ;;  %v706_v16 = vrot.slane %v705_v59, 4  ;;  %v710_v19 = vrot.slane %v708_v48, 5  ;;  %v3238_v20 = vcombine.low %v893_v1, %v903_v14  ;;  %v3243_v30 = vld [vmem:[#allocation2 + $0x9c] sm:$0xf] }
  0x60   : > { %1616 = vrot.lane.b32.xlu1 %v2919_v44, %s2739_s13  ;;  %v382_v44 = vld [vmem:[%s2833_s7 + $0xbc] sm:$0x1]  ;;  %v905_v46 = vshrl.u32 %v3181_v8, 16  ;;  %v908_v15 = vshll.u32 %v3181_v8, 16  ;;  %v918_v42 = vshrl.u32 %v3189_v58, 16  ;;  %v914_v23 = vshll.u32 %v3189_v58, 16 }
  0x61   : > { %432 = vst.msk [vmem:[#allocation2 + $0xbc] sm:$0x1] %vm386_vm1, %v382_v44  ;;  %v3248_v32 = vld [vmem:[#allocation2 + $0xa0] sm:$0xf]  ;;  %v1213_v33 = vrot.slane %v1211_v40, 4  ;;  %v1214_v4 = vrot.slane %v3170_v25, 5  ;;  %v711_v37 = vsel %vm2986_vm8, %v706_v16, %v710_v19 }
  0x62   : > { %1532 = vrot.lane.b32.xlu0 %v3185_v53, %s2738_s12  ;;  %601 = vst.msk [vmem:[#allocation3 + $0x20] sm:$0xff] %vm596_vm2, %v3221_v29  ;;  %v713_v34 = vshrl.u32 %v3199_v43, 16  ;;  %v716_v50 = vshll.u32 %v3199_v43, 16  ;;  %v2423_v41 = vrot.slane %v3113_v3, 9  ;;  %v1158_v51 = vrot.slane %v3187_v35, 5 }
  0x63   : > { %v3262_v57 = vld [vmem:[#allocation2 + $0x98] sm:$0x1]  ;;  %v3264_v60 = vld [vmem:[#allocation2 + $0x3c] sm:$0xf]  ;;  %v1157_v25 = vrot.slane %v1155_v21, 4  ;;  %v907_v63 = vrot.slane %v905_v46, 4  ;;  %v1215_v44 = vsel %vm2944_vm7, %v1213_v33, %v1214_v4 }
  0x64   : > { %1618 = vrot.lane.b32.xlu1 %v3132_v11, %s2739_s13  ;;  %v910_v2 = vrot.slane %v908_v15, 5  ;;  %v3272_v47 = vld [vmem:[#allocation2 + $0x40] sm:$0xf]  ;;  %v3274_v36 = vrot.slane %v914_v23, 5  ;;  %v920_v3 = vrot.slane %v918_v42, 4  ;;  %v715_v6 = vrot.slane %v713_v34, 4 }
  0x65   : > { %v718_v9 = vrot.slane %v716_v50, 5  ;;  %v726_v12 = vshrl.u32 %v3201_v7, 16  ;;  %v924_v24 = vshll.u32 %v3262_v57, 16  ;;  %v3288_v59 = vld [vmem:[#allocation2 + $0x38] sm:$0x1]  ;;  %v3292_v48 = vcombine.low %v3264_v60, %v3272_v47 }
  0x66   : > { %1600 = vrot.lane.b32.xlu0 %v2935_v52, %s2739_s13  ;;  %v2431_v52 = vrot.slane %v3092_v49, 9  ;;  %v701_v49 = vsel %vm2986_vm8, %v696_v17, %v3192_v61  ;;  %v3270_v61 = vcombine.low %v3243_v30, %v3248_v32  ;;  %v1156_v1 = vsel %vm2944_vm7, %v2423_v41, %v1155_v21  ;;  %v3315_v4 = vld [vmem:[#allocation2 + $0xa4] sm:$0x1] }
  0x67   : > { %v3278_v35 = vcombine.low %v701_v49, %v711_v37  ;;  %v1159_v14 = vsel %vm2944_vm7, %v1157_v25, %v1158_v51  ;;  %v722_v17 = vshll.u32 %v3201_v7, 16  ;;  %v921_v16 = vor.u32 %v920_v3, %v3274_v36  ;;  %602 = vst.msk [vmem:[#allocation3 + $0x28] sm:$0xff] %vm596_vm2, %v3292_v48 }
  0x68   : > { %1708 = vrot.lane.b32.xlu1 %v3122_v5, %s2740_s14  ;;  %v1212_v38 = vsel %vm2944_vm7, %v2431_v52, %v1211_v40  ;;  %610 = vst.msk [vmem:[#allocation3 + $0x68] sm:$0xff] %vm596_vm2, %v3270_v61  ;;  %v911_v40 = vor.u32 %v910_v2, %v907_v63  ;;  %v719_v19 = vor.u32 %v718_v9, %v715_v6  ;;  %v732_v46 = vshll.u32 %v3288_v59, 16 }
  0x69   : > { %v3307_v15 = vcombine.low %v1212_v38, %v1215_v44  ;;  %v3309_v21 = vcombine.low %v1156_v1, %v1159_v14  ;;  %v926_v52 = vrot.slane %v924_v24, 5  ;;  %v728_v42 = vrot.slane %v726_v12, 4 }
  0x6a   : > { %1602 = vrot.lane.b32.xlu0 %v3155_v13, %s2739_s13  ;;  %v912_v23 = vrot.slane %v911_v40, 4  ;;  %v3313_v33 = vrot.slane %v722_v17, 5  ;;  %v2433_v34 = vrot.slane %v3243_v30, 9  ;;  %v1225_v50 = vrot.slane %v3248_v32, 5 }
  0x6b   : > { %v922_v49 = vrot.slane %v921_v16, 4  ;;  %v2432_v37 = vrot.slane %v3181_v8, 9  ;;  %v1218_v41 = vrot.slane %v3189_v58, 5  ;;  %v1228_v51 = vrot.slane %v3315_v4, 5  ;;  %v3332_v8 = vld [vmem:[#allocation2 + $0x44] sm:$0x1] }
  0x6c   : > { %1710 = vrot.lane.b32.xlu1 %v3238_v20, %s2740_s14  ;;  %v3326_v25 = vrot.slane %v732_v46, 5  ;;  %v1226_v63 = vsel %vm2944_vm7, %v2433_v34, %v1225_v50  ;;  %v1227_v2 = vrot.slane %v1225_v50, 4  ;;  %v1221_v3 = vrot.slane %v3262_v57, 5  ;;  %v3362_v46 = vld [vmem:[#allocation2 + $0xa8] sm:$0xf] }
  0x6d   : > { %v2425_v58 = vrot.slane %v3264_v60, 9  ;;  %v1169_v6 = vrot.slane %v3272_v47, 5  ;;  %v917_v9 = vsel %vm2986_vm8, %v912_v23, %v3274_v36  ;;  %v729_v44 = vor.u32 %v728_v42, %v3313_v33  ;;  %v3375_v50 = vld [vmem:[#allocation2 + $0x48] sm:$0xf] }
  0x6e   : > { %1692 = vrot.lane.b32.xlu0 %v3151_v39, %s2740_s14  ;;  %v1229_v57 = vsel %vm2944_vm7, %v1227_v2, %v1228_v51  ;;  %v1172_v12 = vrot.slane %v3332_v8, 5  ;;  %v927_v24 = vsel %vm2986_vm8, %v922_v49, %v926_v52  ;;  %v3359_v17 = vsel %vm2944_vm7, %v2432_v37, %v1218_v41  ;;  %v3364_v52 = vld [vmem:[#allocation2 + $0xac] sm:$0xf]  ;;  %v490_v2 = vld [vmem:[#allocation2 + $0xb0] sm:$0x1] }
  0x6f   : > { %v3347_v1 = vcombine.low %v1226_v63, %v1229_v57  ;;  %v1170_v14 = vsel %vm2944_vm7, %v2425_v58, %v1169_v6  ;;  %v1171_v40 = vrot.slane %v1169_v6, 4  ;;  %v1220_v16 = vrot.slane %v1218_v41, 4  ;;  %v3377_v49 = vld [vmem:[#allocation2 + $0x4c] sm:$0xf] }
  0x70   : > { %1784 = vrot.lane.b32.xlu1 %v3161_v45, %s2741_s21  ;;  %v2388_v23 = vcombine.low %v2955_v62, %v2962_v0  ;;  %v3373_v34 = vcombine.low %v2938_v54, %v2940_v55  ;;  %v3381_v37 = vcombine.low %v917_v9, %v927_v24  ;;  %v3383_v41 = vrot.slane %v729_v44, 4 }
  0x71   : > { %v3393_v54 = vcombine.low %v3362_v46, %v3364_v52  ;;  %v953_v55 = vshrl.u32 %v3362_v46, 16  ;;  %v956_v62 = vshll.u32 %v3362_v46, 16  ;;  %v966_v0 = vshrl.u32 %v3364_v52, 16 }
  0x72   : > { %1694 = vrot.lane.b32.xlu0 %v3278_v35, %s2740_s14  ;;  %4147 = vst [vmem:[#allocation12_spill] sm:$0xff] %v3373_v34  ;;  %597 = vst.msk [vmem:[#allocation3] sm:$0xff] %vm596_vm2, %v2388_v23  ;;  %v3402_v58 = vcombine.low %v3375_v50, %v3377_v49  ;;  %v761_v6 = vshrl.u32 %v3375_v50, 16  ;;  %v764_v9 = vshll.u32 %v3375_v50, 16  ;;  %v774_v44 = vshrl.u32 %v3377_v49, 16 }
  0x73   : > { %605 = vst.msk [vmem:[#allocation3 + $0x40] sm:$0xff] %vm596_vm2, %v3373_v34  ;;  %v3409_v57 = vsel %vm2944_vm7, %v1220_v16, %v1221_v3  ;;  %611 = vst.msk [vmem:[#allocation3 + $0x70] sm:$0xff] %vm596_vm2, %v3393_v54  ;;  %v958_v24 = vrot.slane %v956_v62, 5  ;;  %v972_v23 = vshll.u32 %v490_v2, 16  ;;  %v770_v51 = vshll.u32 %v3377_v49, 16 }
  0x74   : > { %1068 = vrot.lane.b32.xlu1 %v3122_v5, %s2736_s10  ;;  %v3324_v5 = vrot.slane %v719_v19, 4  ;;  %603 = vst.msk [vmem:[#allocation3 + $0x30] sm:$0xff] %vm596_vm2, %v3402_v58  ;;  %v763_v42 = vrot.slane %v761_v6, 4  ;;  %v766_v3 = vrot.slane %v764_v9, 5  ;;  %v2434_v9 = vrot.slane %v3362_v46, 9 }
  0x75   : > { %v974_v62 = vrot.slane %v972_v23, 5  ;;  %v772_v6 = vrot.slane %v770_v51, 5  ;;  %v433_v46 = vld [vmem:[%s3438_s29] sm:$0xf] }
  0x76   : > { %1768 = vrot.lane.b32.xlu0 %v3185_v53, %s2741_s21  ;;  %v767_v19 = vor.u32 %v766_v3, %v763_v42  ;;  %v2426_v3 = vrot.slane %v3375_v50, 9  ;;  %440 = vst.msk [vmem:[#allocation2 + $0xc0] sm:$0xf] %vm383_vm0, %v433_v46 }
  0x78   : > { %1786 = vrot.lane.b32.xlu1 %v3307_v15, %s2741_s21 }
  0x7a   : > { %1052 = vrot.lane.b32.xlu0 %v3151_v39, %s2736_s10  ;;  %v1173_v39 = vsel %vm2944_vm7, %v1171_v40, %v1172_v12  ;;  %v955_v12 = vrot.slane %v953_v55, 4  ;;  %v466_v40 = vld [vmem:[#allocation2 + $0x50] sm:$0x1]  ;;  %v776_v55 = vrot.slane %v774_v44, 4  ;;  %v768_v44 = vrot.slane %v767_v19, 4 }
  0x7b   : > { %v3386_v63 = vcombine.low %v1170_v14, %v1173_v39  ;;  %v962_v14 = vshll.u32 %v3364_v52, 16  ;;  %v968_v39 = vrot.slane %v966_v0, 4  ;;  %v780_v0 = vshll.u32 %v466_v40, 16 }
  0x7c   : > { %1070 = vrot.lane.b32.xlu1 %v3238_v20, %s2736_s10  ;;  %v959_v16 = vor.u32 %v958_v24, %v955_v12  ;;  %v1232_v24 = vrot.slane %v3364_v52, 5  ;;  %v777_v42 = vor.u32 %v776_v55, %v772_v6  ;;  %v773_v19 = vsel %vm2986_vm8, %v768_v44, %v772_v6  ;;  %v434_v52 = vld [vmem:[%s3438_s29 + $0x4] sm:$0xf]  ;;  %v492_v55 = vld [vmem:[#allocation2 + $0xb8] sm:$0xf] }
  0x7d   : > { %v964_v38 = vrot.slane %v962_v14, 5  ;;  %v782_v12 = vrot.slane %v780_v0, 5  ;;  %v1235_v14 = vrot.slane %v490_v2, 5  ;;  %441 = vst.msk [vmem:[#allocation2 + $0xc4] sm:$0xf] %vm383_vm0, %v434_v52  ;;  %v1239_v31 = vrot.slane %v492_v55, 5 }
  0x7e   : > { %1770 = vrot.lane.b32.xlu0 %v3309_v21, %s2741_s21  ;;  %v960_v36 = vrot.slane %v959_v16, 4  ;;  %v778_v2 = vrot.slane %v777_v42, 4  ;;  %v1179_v16 = vrot.slane %v466_v40, 5  ;;  %v3462_v6 = vld [vmem:[#allocation2 + $0x54] sm:$0xf] }
  0x7f   : > { %v969_v26 = vor.u32 %v968_v39, %v964_v38  ;;  %v3433_v39 = vld [vmem:[#allocation2 + $0xb4] sm:$0xf]  ;;  %v3464_v40 = vld [vmem:[#allocation2 + $0x58] sm:$0xf]  ;;  %v788_v52 = vshll.u32 %v3462_v6, 16 }
  0x80   : > { %1312 = vrot.lane.b32.xlu1 %v3161_v45, %s2735_s9  ;;  %v965_v45 = vsel %vm2986_vm8, %v960_v36, %v964_v38  ;;  %v1234_v38 = vrot.slane %v1232_v24, 4  ;;  %v1176_v36 = vrot.slane %v3377_v49, 5  ;;  %v977_v42 = vshrl.u32 %v3433_v39, 16 }
  0x81   : > { %v970_v23 = vrot.slane %v969_v26, 4  ;;  %v1233_v26 = vsel %vm2944_vm7, %v2434_v9, %v1232_v24  ;;  %v3488_v46 = vcombine.low %v3462_v6, %v3464_v40  ;;  %v794_v9 = vshll.u32 %v3464_v40, 16 }
  0x82   : > { %1054 = vrot.lane.b32.xlu0 %v3278_v35, %s2736_s10  ;;  %v1236_v49 = vsel %vm2944_vm7, %v1234_v38, %v1235_v14  ;;  %v1177_v0 = vsel %vm2944_vm7, %v2426_v3, %v1176_v36  ;;  %v493_v3 = vld [vmem:[#allocation2 + $0xbc] sm:$0x1]  ;;  %v435_v38 = vld [vmem:[%s3438_s29 + $0x8] sm:$0x1] }
  0x83   : > { %v975_v51 = vsel %vm2986_vm8, %v970_v23, %v974_v62  ;;  %v1178_v62 = vrot.slane %v1176_v36, 4  ;;  %v3479_v23 = vcombine.low %v3433_v39, %v492_v55  ;;  %4148 = vst [vmem:[#allocation13_spill] sm:$0xff] %v3488_v46  ;;  %442 = vst.msk [vmem:[#allocation2 + $0xc8] sm:$0x1] %vm386_vm1, %v435_v38  ;;  %v790_v38 = vrot.slane %v788_v52, 5 }
  0x84   : > { %1314 = vrot.lane.b32.xlu1 %v3307_v15, %s2735_s9  ;;  %604 = vst.msk [vmem:[#allocation3 + $0x38] sm:$0xff] %vm596_vm2, %v3488_v46 }
  0x85   : > { %v1180_v14 = vsel %vm2944_vm7, %v1178_v62, %v1179_v16  ;;  %612 = vst.msk [vmem:[#allocation3 + $0x78] sm:$0xff] %vm596_vm2, %v3479_v23  ;;  %v469_v16 = vld [vmem:[#allocation2 + $0x5c] sm:$0x1] }
  0x86   : > { %1296 = vrot.lane.b32.xlu0 %v3185_v53, %s2735_s9  ;;  %v3456_v53 = vcombine.low %v965_v45, %v975_v51  ;;  %v3470_v45 = vcombine.low %v1233_v26, %v1236_v49  ;;  %v3483_v36 = vcombine.low %v1177_v0, %v1180_v14  ;;  %v990_v26 = vshrl.u32 %v492_v55, 16 }
  0x87   : > { %v798_v51 = vshrl.u32 %v3464_v40, 16  ;;  %v986_v0 = vshll.u32 %v492_v55, 16 }
  0x88   : > { %1382 = vrot.lane.b32.xlu1 %v3132_v11, %s2734_s8  ;;  %v783_v11 = vsel %vm2986_vm8, %v778_v2, %v782_v12  ;;  %v980_v12 = vshll.u32 %v3433_v39, 16  ;;  %v979_v2 = vrot.slane %v977_v42, 4  ;;  %v992_v62 = vrot.slane %v990_v26, 4 }
  0x89   : > { %v3474_v24 = vcombine.low %v773_v19, %v783_v11  ;;  %v785_v19 = vshrl.u32 %v3462_v6, 16  ;;  %v996_v11 = vshll.u32 %v493_v3, 16  ;;  %v800_v44 = vrot.slane %v798_v51, 4 }
  0x8a   : > { %1298 = vrot.lane.b32.xlu0 %v3309_v21, %s2735_s9  ;;  %v982_v49 = vrot.slane %v980_v12, 5  ;;  %v988_v28 = vrot.slane %v986_v0, 5  ;;  %v804_v42 = vshll.u32 %v469_v16, 16  ;;  %v796_v12 = vrot.slane %v794_v9, 5 }
  0x8b   : > { %v787_v14 = vrot.slane %v785_v19, 4  ;;  %v998_v27 = vrot.slane %v996_v11, 5  ;;  %v2435_v26 = vrot.slane %v3433_v39, 9  ;;  %v1242_v19 = vrot.slane %v493_v3, 5 }
  0x8c   : > { %1384 = vrot.lane.b32.xlu1 %v3208_v10, %s2734_s8  ;;  %v983_v50 = vor.u32 %v982_v49, %v979_v2  ;;  %v993_v46 = vor.u32 %v992_v62, %v988_v28  ;;  %v801_v51 = vor.u32 %v800_v44, %v796_v12  ;;  %v1241_v49 = vrot.slane %v1239_v31, 4 }
  0x8d   : > { %v791_v18 = vor.u32 %v790_v38, %v787_v14  ;;  %v1240_v2 = vsel %vm2944_vm7, %v2435_v26, %v1239_v31  ;;  %v2427_v39 = vrot.slane %v3462_v6, 9  ;;  %v1186_v3 = vrot.slane %v469_v16, 5 }
  0x8e   : > { %1366 = vrot.lane.b32.xlu0 %v3155_v13, %s2734_s8  ;;  %v984_v34 = vrot.slane %v983_v50, 4  ;;  %v806_v13 = vrot.slane %v804_v42, 5  ;;  %v994_v9 = vrot.slane %v993_v46, 4  ;;  %v1183_v50 = vrot.slane %v3464_v40, 5 }
  0x8f   : > { %v792_v52 = vrot.slane %v791_v18, 4  ;;  %v802_v18 = vrot.slane %v801_v51, 4  ;;  %v1243_v44 = vsel %vm2944_vm7, %v1241_v49, %v1242_v19  ;;  %v4149_v40 = vsel %vm2986_vm8, %v3383_v41, %v3326_v25 }
  0x90   : > { %1474 = vrot.lane.b32.xlu1 %v3238_v20, %s2737_s11  ;;  %v989_v20 = vsel %vm2986_vm8, %v984_v34, %v988_v28  ;;  %v999_v31 = vsel %vm2986_vm8, %v994_v9, %v998_v27  ;;  %v3522_v28 = vcombine.low %v1240_v2, %v1243_v44  ;;  %v1184_v34 = vsel %vm2944_vm7, %v2427_v39, %v1183_v50  ;;  %v436_v9 = vld [vmem:[%s3438_s29 + $0xc] sm:$0xf]  ;;  %v437_v39 = vld [vmem:[%s3438_s29 + $0x10] sm:$0xf] }
  0x91   : > { %v797_v55 = vsel %vm2986_vm8, %v792_v52, %v796_v12  ;;  %v1185_v6 = vrot.slane %v1183_v50, 4  ;;  %v4150_v46 = vsel %vm2986_vm8, %v3324_v5, %v3313_v33  ;;  %v4151_v16 = vrot.slane %v3201_v7, 5  ;;  %443 = vst.msk [vmem:[#allocation2 + $0xcc] sm:$0xf] %vm383_vm0, %v436_v9  ;;  %444 = vst.msk [vmem:[#allocation2 + $0xd0] sm:$0xf] %vm383_vm0, %v437_v39 }
  0x92   : > { %1368 = vrot.lane.b32.xlu0 %v3221_v29, %s2734_s8  ;;  %v3538_v27 = vcombine.low %v4150_v46, %v4149_v40  ;;  %v3542_v62 = vcombine.low %v989_v20, %v999_v31  ;;  %v3554_v33 = vcombine.low %v3359_v17, %v3409_v57  ;;  %v4152_v41 = vshrl.u32 %v3243_v30, 16 }
  0x93   : > { %v1164_v0 = vrot.slane %v4151_v16, 4  ;;  %v1187_v25 = vsel %vm2944_vm7, %v1185_v6, %v1186_v3  ;;  %v4153_v38 = vshll.u32 %v3243_v30, 16  ;;  %v4154_v12 = vshll.u32 %v3248_v32, 16 }
  0x94   : > { %1476 = vrot.lane.b32.xlu1 %v3381_v37, %s2737_s11  ;;  %v3556_v5 = vcombine.low %v1184_v34, %v1187_v25  ;;  %v931_v14 = vrot.slane %v4152_v41, 4  ;;  %v4156_v17 = vmov %v4151_v16  ;;  %v4157_v57 = vrot.slane %v3199_v43, 9 }
  0x95   : > { %v934_v42 = vrot.slane %v4153_v38, 5  ;;  %v940_v26 = vrot.slane %v4154_v12, 5  ;;  %v4158_v30 = vrot.slane %v3288_v59, 5  ;;  %v737_v51 = vshrl.u32 %v3264_v60, 16 }
  0x96   : > { %1458 = vrot.lane.b32.xlu0 %v3278_v35, %s2737_s11  ;;  %v807_v35 = vsel %vm2986_vm8, %v802_v18, %v806_v13  ;;  %v4155_v13 = vshrl.u32 %v3248_v32, 16  ;;  %v1163_v19 = vsel %vm2944_vm7, %v4157_v57, %v4156_v17  ;;  %v740_v32 = vshll.u32 %v3264_v60, 16 }
  0x97   : > { %v3546_v11 = vcombine.low %v797_v55, %v807_v35  ;;  %v1166_v52 = vsel %vm2944_vm7, %v1164_v0, %v4158_v30  ;;  %v750_v2 = vshrl.u32 %v3272_v47, 16  ;;  %v746_v49 = vshll.u32 %v3272_v47, 16 }
  0x98   : > { %1550 = vrot.lane.b32.xlu1 %v3307_v15, %s2738_s12  ;;  %v944_v15 = vrot.slane %v4155_v13, 4  ;;  %v935_v43 = vor.u32 %v934_v42, %v931_v14  ;;  %v948_v20 = vshll.u32 %v3315_v4, 16  ;;  %v3587_v59 = vcombine.low %v1163_v19, %v1166_v52 }
  0x99   : > { %v739_v60 = vrot.slane %v737_v51, 4  ;;  %v742_v50 = vrot.slane %v740_v32, 5  ;;  %v748_v55 = vrot.slane %v746_v49, 5  ;;  %v752_v18 = vrot.slane %v750_v2, 4 }
  0x9a   : > { %1460 = vrot.lane.b32.xlu0 %v3538_v27, %s2737_s11  ;;  %v945_v7 = vor.u32 %v944_v15, %v940_v26  ;;  %v936_v47 = vrot.slane %v935_v43, 4  ;;  %v950_v44 = vrot.slane %v948_v20, 5  ;;  %v756_v34 = vshll.u32 %v3332_v8, 16 }
  0x9b   : > { %v743_v3 = vor.u32 %v742_v50, %v739_v60  ;;  %v753_v31 = vor.u32 %v752_v18, %v748_v55  ;;  %vm1816_vm0 = vcmask 589312   ;;  %v2742_v39 = vmov 0   ;;  %v4159_v60 = vld [vmem:[#allocation13_spill] sm:$0xff] }
  0x9c   : > { %1552 = vrot.lane.b32.xlu1 %v3554_v33, %s2738_s12  ;;  %v946_v4 = vrot.slane %v945_v7, 4  ;;  %v758_v35 = vrot.slane %v756_v34, 5  ;;  %v3747_v34 = vld [vmem:[#allocation2 + $0xc4] sm:$0xf] }
  0x9d   : > { %v744_v16 = vrot.slane %v743_v3, 4  ;;  %v754_v0 = vrot.slane %v753_v31, 4  ;;  %v3745_v31 = vld [vmem:[#allocation2 + $0xc0] sm:$0xf] }
  0x9e   : > { %1534 = vrot.lane.b32.xlu0 %v3309_v21, %s2738_s12  ;;  %v438_v21 = vld [vmem:[%s3438_s29 + $0x14] sm:$0x1]  ;;  %v951_v46 = vsel %vm2986_vm8, %v946_v4, %v950_v44 }
  0x9f   : > { %445 = vst.msk [vmem:[#allocation2 + $0xd4] sm:$0x1] %vm386_vm1, %v438_v21  ;;  %v749_v41 = vsel %vm2986_vm8, %v744_v16, %v748_v55  ;;  %v759_v14 = vsel %vm2986_vm8, %v754_v0, %v758_v35  ;;  %vm1833_vm1 = vcmask 1048128   ;;  %v2646_v21 = vld [vmem:[%s4122_s2] sm:$0xff]   ;;  %v1437_v16 = vshll.u32 %v3747_v34, 16  ;;  %v2648_v35 = vld [vmem:[%s4122_s2 + $0x10] sm:$0xff]  }
  0xa0   : > { %1620 = vrot.lane.b32.xlu1 %v3208_v10, %s2739_s13  ;;  %v941_v10 = vsel %vm2986_vm8, %v936_v47, %v940_v26  ;;  %2499 = vmatprep.subr.bf16.mxu0 %v2646_v21 }
  0xa1   : > { %v2417_v8 = vcombine.low %v941_v10, %v951_v46  ;;  %2547 = vmatprep.subr.bf16.mxu1 %v2646_v21  ;;  %2500 = vmatpush3.bf16.msra.mxu0 %v2646_v21  ;;  %v1431_v10 = vshll.u32 %v3745_v31, 16  ;;  %v1441_v46 = vshrl.u32 %v3747_v34, 16 }
  0xa2   : > { %1536 = vrot.lane.b32.xlu0 %v3587_v59, %s2738_s12  ;;  %v1379_v6 = vpop.permute.xlu1 %1378  ;;  %2555 = vmatpush3.bf16.msra.mxu1 %v2646_v21 }
  0xa3   : > { %v1363_v40 = vpop.permute.xlu0 %1362 }
  0xa4   : > { %1622 = vrot.lane.b32.xlu1 %v3270_v61, %s2739_s13 }
  0xa6   : > { %1604 = vrot.lane.b32.xlu0 %v3221_v29, %s2739_s13  ;;  %v1381_v25 = vpop.permute.xlu1 %1380  ;;  %v3619_v29 = vcombine.low %v749_v41, %v759_v14  ;;  %v1433_v41 = vrot.slane %v1431_v10, 5  ;;  %v1439_v14 = vrot.slane %v1437_v16, 5 }
  0xa7   : > { %v1365_v38 = vpop.permute.xlu0 %1364 }
  0xa8   : > { %1712 = vrot.lane.b32.xlu1 %v3381_v37, %s2740_s14 }
  0xaa   : > { %1606 = vrot.lane.b32.xlu0 %v3292_v48, %s2739_s13 }
  0xac   : > { %1714 = vrot.lane.b32.xlu1 %v2417_v8, %s2740_s14 }
  0xae   : > { %1696 = vrot.lane.b32.xlu0 %v3538_v27, %s2740_s14  ;;  %v1309_v42 = vpop.permute.xlu1 %1308 }
  0xb0   : > { %1788 = vrot.lane.b32.xlu1 %v3554_v33, %s2741_s21  ;;  %v1293_v12 = vpop.permute.xlu0 %1292 }
  0xb2   : > { %1698 = vrot.lane.b32.xlu0 %v3619_v29, %s2740_s14  ;;  %v1311_v26 = vpop.permute.xlu1 %1310 }
  0xb4   : > { %1072 = vrot.lane.b32.xlu1 %v3381_v37, %s2736_s10  ;;  %v1295_v13 = vpop.permute.xlu0 %1294 }
  0xb6   : > { %1772 = vrot.lane.b32.xlu0 %v3587_v59, %s2741_s21  ;;  %v1051_v15 = vpop.permute.xlu1 %1050 }
  0xb7   : > { %1098 = vst.msk [vmem:[#allocation3 + $0x8] sm:$0xff] %vm1096_vm9, %v1051_v15 }
  0xb8   : > { %1790 = vrot.lane.b32.xlu1 %v3347_v1, %s2741_s21  ;;  %1342 = vst.msk [vmem:[#allocation3 + $0x8] sm:$0xff] %vm1340_vm10, %v1295_v13 }
  0xb9   : > { %1412 = vst.msk [vmem:[#allocation3 + $0x8] sm:$0xff] %vm1410_vm11, %v1365_v38  ;;  %v1443_v38 = vrot.slane %v1441_v46, 4  ;;  %v4161_v46 = vld [vmem:[#allocation11_spill] sm:$0xff] }
  0xba   : > { %1056 = vrot.lane.b32.xlu0 %v3538_v27, %s2736_s10 }
  0xbb   : > { %v1444_v13 = vor.u32 %v1443_v38, %v1439_v14 }
  0xbc   : > { %v1049_v37 = vpop.permute.xlu0 %1048  ;;  %1074 = vrot.lane.b32.xlu1 %v2417_v8, %s2736_s10 }
  0xbd   : > { %1097 = vst.msk [vmem:[#allocation3] sm:$0xff] %vm1096_vm9, %v1049_v37 }
  0xbe   : > { %1774 = vrot.lane.b32.xlu0 %v3386_v63, %s2741_s21  ;;  %1341 = vst.msk [vmem:[#allocation3] sm:$0xff] %vm1340_vm10, %v1293_v12  ;;  %v1067_v17 = vpop.permute.xlu1 %1066 }
  0xbf   : > { %1106 = vst.msk [vmem:[#allocation3 + $0x48] sm:$0xff] %vm1096_vm9, %v1067_v17  ;;  %v2650_v17 = vld [vmem:[%s4122_s2 + $0x20] sm:$0xff]  }
  0xc0   : > { %1411 = vst.msk [vmem:[#allocation3] sm:$0xff] %vm1410_vm11, %v1363_v40  ;;  %1316 = vrot.lane.b32.xlu1 %v3554_v33, %s2735_s9 }
  0xc1   : > { %1350 = vst.msk [vmem:[#allocation3 + $0x48] sm:$0xff] %vm1340_vm10, %v1311_v26 }
  0xc2   : > { %1420 = vst.msk [vmem:[#allocation3 + $0x48] sm:$0xff] %vm1410_vm11, %v1381_v25  ;;  %1058 = vrot.lane.b32.xlu0 %v3619_v29, %s2736_s10  ;;  %v1471_v27 = vpop.permute.xlu1 %1470 }
  0xc4   : > { %v1065_v57 = vpop.permute.xlu0 %1064  ;;  %1318 = vrot.lane.b32.xlu1 %v3347_v1, %s2735_s9 }
  0xc5   : > { %1105 = vst.msk [vmem:[#allocation3 + $0x40] sm:$0xff] %vm1096_vm9, %v1065_v57  ;;  %v3791_v57 = vcombine.low %v3745_v31, %v3747_v34 }
  0xc6   : > { %1349 = vst.msk [vmem:[#allocation3 + $0x40] sm:$0xff] %vm1340_vm10, %v1309_v42  ;;  %1300 = vrot.lane.b32.xlu0 %v3587_v59, %s2735_s9  ;;  %v1473_v19 = vpop.permute.xlu1 %1472  ;;  %v3771_v42 = vld [vmem:[#allocation2 + $0xc8] sm:$0x1] }
  0xc7   : > { %1419 = vst.msk [vmem:[#allocation3 + $0x40] sm:$0xff] %vm1410_vm11, %v1379_v6  ;;  %v2647_v6 = vld [vmem:[%s4122_s2 + $0x8] sm:$0xff]   ;;  %v1447_v15 = vshll.u32 %v3771_v42, 16 }
  0xc8   : > { %1512 = vst.msk [vmem:[#allocation3 + $0x48] sm:$0xff] %vm1502_vm12, %v1473_v19  ;;  %1511 = vst.msk [vmem:[#allocation3 + $0x40] sm:$0xff] %vm1502_vm12, %v1471_v27  ;;  %v1455_v33 = vpop.permute.xlu0 %1454  ;;  %1386 = vrot.lane.b32.xlu1 %v3270_v61, %s2734_s8  ;;  %2501 = vmatprep.subr.bf16.mxu0 %v2647_v6  ;;  %v1445_v19 = vrot.slane %v1444_v13, 4 }
  0xc9   : > { %1503 = vst.msk [vmem:[#allocation3] sm:$0xff] %vm1502_vm12, %v1455_v33  ;;  %2548 = vmatprep.subr.bf16.mxu1 %v2647_v6  ;;  %2502 = vmatpush3.bf16.msra.mxu0 %v2647_v6  ;;  %v1449_v33 = vrot.slane %v1447_v15, 5 }
  0xca   : > { %1302 = vrot.lane.b32.xlu0 %v3386_v63, %s2735_s9  ;;  %v1547_v30 = vpop.permute.xlu1 %1546  ;;  %2556 = vmatpush3.bf16.msra.mxu1 %v2647_v6 }
  0xcb   : > { %1587 = vst.msk [vmem:[#allocation3 + $0x40] sm:$0xff] %vm1578_vm13, %v1547_v30  ;;  %2503 = vmatprep.subr.bf16.mxu0 %v2648_v35  ;;  %2549 = vmatprep.subr.bf16.mxu1 %v2648_v35 }
  0xcc   : > { %v1457_v52 = vpop.permute.xlu0 %1456  ;;  %1388 = vrot.lane.b32.xlu1 %v3393_v54, %s2734_s8 }
  0xcd   : > { %1504 = vst.msk [vmem:[#allocation3 + $0x8] sm:$0xff] %vm1502_vm12, %v1457_v52  ;;  %2504 = vmatpush3.bf16.msra.mxu0 %v2648_v35 }
  0xce   : > { %1370 = vrot.lane.b32.xlu0 %v3292_v48, %s2734_s8  ;;  %v1549_v51 = vpop.permute.xlu1 %1548  ;;  %2557 = vmatpush3.bf16.msra.mxu1 %v2648_v35 }
  0xcf   : > { %1588 = vst.msk [vmem:[#allocation3 + $0x48] sm:$0xff] %vm1578_vm13, %v1549_v51  ;;  %v1522_v51 = vrot.slane %v3747_v34, 5 }
  0xd0   : > { %v1531_v61 = vpop.permute.xlu0 %1530  ;;  %1478 = vrot.lane.b32.xlu1 %v2417_v8, %s2737_s11 }
  0xd1   : > { %1579 = vst.msk [vmem:[#allocation3] sm:$0xff] %vm1578_vm13, %v1531_v61 }
  0xd2   : > { %1372 = vrot.lane.b32.xlu0 %v3402_v58, %s2734_s8  ;;  %v1617_v32 = vpop.permute.xlu1 %1616 }
  0xd3   : > { %1657 = vst.msk [vmem:[#allocation3 + $0x40] sm:$0xff] %vm1648_vm14, %v1617_v32  ;;  %v1450_v32 = vsel %vm2986_vm8, %v1445_v19, %v1449_v33  ;;  %v4163_v33 = vld [vmem:[#allocation7_spill] sm:$0xff] }
  0xd4   : > { %v1533_v2 = vpop.permute.xlu0 %1532  ;;  %1480 = vrot.lane.b32.xlu1 %v3456_v53, %s2737_s11 }
  0xd5   : > { %1580 = vst.msk [vmem:[#allocation3 + $0x8] sm:$0xff] %vm1578_vm13, %v1533_v2 }
  0xd6   : > { %1462 = vrot.lane.b32.xlu0 %v3619_v29, %s2737_s11  ;;  %v1619_v48 = vpop.permute.xlu1 %1618 }
  0xd7   : > { %1658 = vst.msk [vmem:[#allocation3 + $0x48] sm:$0xff] %vm1648_vm14, %v1619_v48  ;;  %v2652_v48 = vld [vmem:[%s4122_s2 + $0x30] sm:$0xff]  }
  0xd8   : > { %v1601_v49 = vpop.permute.xlu0 %1600  ;;  %1554 = vrot.lane.b32.xlu1 %v3347_v1, %s2738_s12 }
  0xd9   : > { %1649 = vst.msk [vmem:[#allocation3] sm:$0xff] %vm1648_vm14, %v1601_v49 }
  0xda   : > { %1464 = vrot.lane.b32.xlu0 %v3474_v24, %s2737_s11  ;;  %v1709_v43 = vpop.permute.xlu1 %1708 }
  0xdb   : > { %1749 = vst.msk [vmem:[#allocation3 + $0x40] sm:$0xff] %vm1740_vm15, %v1709_v43 }
  0xdc   : > { %v1603_v7 = vpop.permute.xlu0 %1602  ;;  %1556 = vrot.lane.b32.xlu1 %v3470_v45, %s2738_s12 }
  0xdd   : > { %1650 = vst.msk [vmem:[#allocation3 + $0x8] sm:$0xff] %vm1648_vm14, %v1603_v7  ;;  %v2454_v7 = vrot.slane %v3745_v31, 9 }
  0xde   : > { %1538 = vrot.lane.b32.xlu0 %v3386_v63, %s2738_s12  ;;  %v1711_v20 = vpop.permute.xlu1 %1710 }
  0xdf   : > { %1750 = vst.msk [vmem:[#allocation3 + $0x48] sm:$0xff] %vm1740_vm15, %v1711_v20  ;;  %v1524_v20 = vrot.slane %v1522_v51, 4 }
  0xe0   : > { %v1693_v1 = vpop.permute.xlu0 %1692  ;;  %1624 = vrot.lane.b32.xlu1 %v3393_v54, %s2739_s13 }
  0xe1   : > { %1741 = vst.msk [vmem:[#allocation3] sm:$0xff] %vm1740_vm15, %v1693_v1  ;;  %v1525_v1 = vrot.slane %v3771_v42, 5 }
  0xe2   : > { %1540 = vrot.lane.b32.xlu0 %v3483_v36, %s2738_s12  ;;  %v1785_v59 = vpop.permute.xlu1 %1784 }
  0xe3   : > { %1825 = vst.msk [vmem:[#allocation3 + $0x40] sm:$0xff] %vm1816_vm0, %v1785_v59  ;;  %v4160_v59 = vld [vmem:[#allocation12_spill] sm:$0xff] }
  0xe4   : > { %v1695_v9 = vpop.permute.xlu0 %1694  ;;  %1842 = vst.msk [vmem:[#allocation3 + $0x40] sm:$0xff] %vm1833_vm1, %v2742_v39  ;;  %1626 = vrot.lane.b32.xlu1 %v3479_v23, %s2739_s13 }
  0xe5   : > { %1742 = vst.msk [vmem:[#allocation3 + $0x8] sm:$0xff] %vm1740_vm15, %v1695_v9 }
  0xe6   : > { %1608 = vrot.lane.b32.xlu0 %v3402_v58, %s2739_s13  ;;  %v1069_v63 = vpop.permute.xlu1 %1068 }
  0xe7   : > { %1107 = vst.msk [vmem:[#allocation3 + $0x50] sm:$0xff] %vm1096_vm9, %v1069_v63  ;;  %v3823_v63 = vld [vmem:[#allocation2 + $0xcc] sm:$0xf] }
  0xe8   : > { %v1769_v54 = vpop.permute.xlu0 %1768  ;;  %1716 = vrot.lane.b32.xlu1 %v3456_v53, %s2740_s14 }
  0xe9   : > { %1817 = vst.msk [vmem:[#allocation3] sm:$0xff] %vm1816_vm0, %v1769_v54  ;;  %v3825_v54 = vld [vmem:[#allocation2 + $0xd0] sm:$0xf] }
  0xea   : > { %1834 = vst.msk [vmem:[#allocation3] sm:$0xff] %vm1833_vm1, %v2742_v39  ;;  %1610 = vrot.lane.b32.xlu0 %v4159_v60, %s2739_s13  ;;  %v1787_v50 = vpop.permute.xlu1 %1786  ;;  %v2456_v38 = vcombine.low %v3823_v63, %v3825_v54 }
  0xeb   : > { %1826 = vst.msk [vmem:[#allocation3 + $0x48] sm:$0xff] %vm1816_vm0, %v1787_v50  ;;  %v1523_v50 = vsel %vm2944_vm7, %v2454_v7, %v1522_v51 }
  0xec   : > { %v1053_v55 = vpop.permute.xlu0 %1052  ;;  %1843 = vst.msk [vmem:[#allocation3 + $0x48] sm:$0xff] %vm1833_vm1, %v2742_v39  ;;  %1718 = vrot.lane.b32.xlu1 %v3542_v62, %s2740_s14 }
  0xed   : > { %1099 = vst.msk [vmem:[#allocation3 + $0x10] sm:$0xff] %vm1096_vm9, %v1053_v55  ;;  %v1526_v55 = vsel %vm2944_vm7, %v1524_v20, %v1525_v1 }
  0xee   : > { %1700 = vrot.lane.b32.xlu0 %v3474_v24, %s2740_s14  ;;  %v1071_v58 = vpop.permute.xlu1 %1070 }
  0xef   : > { %1108 = vst.msk [vmem:[#allocation3 + $0x58] sm:$0xff] %vm1096_vm9, %v1071_v58  ;;  %v1666_v58 = vshrl.u32 %v3823_v63, 16 }
  0xf0   : > { %v1771_v18 = vpop.permute.xlu0 %1770  ;;  %1792 = vrot.lane.b32.xlu1 %v3470_v45, %s2741_s21 }
  0xf1   : > { %1818 = vst.msk [vmem:[#allocation3 + $0x8] sm:$0xff] %vm1816_vm0, %v1771_v18  ;;  %v1669_v18 = vshll.u32 %v3823_v63, 16 }
  0xf2   : > { %1835 = vst.msk [vmem:[#allocation3 + $0x8] sm:$0xff] %vm1833_vm1, %v2742_v39  ;;  %1702 = vrot.lane.b32.xlu0 %v3546_v11, %s2740_s14  ;;  %v1313_v47 = vpop.permute.xlu1 %1312 }
  0xf3   : > { %1351 = vst.msk [vmem:[#allocation3 + $0x50] sm:$0xff] %vm1340_vm10, %v1313_v47  ;;  %v1679_v47 = vshrl.u32 %v3825_v54, 16  ;;  %v1859_v6 = vld [vmem:[#allocation3 + $0x48] sm:$0xff] }
  0xf4   : > { %v1055_v4 = vpop.permute.xlu0 %1054  ;;  %1076 = vrot.lane.b32.xlu1 %v3456_v53, %s2736_s10 }
  0xf5   : > { %1100 = vst.msk [vmem:[#allocation3 + $0x18] sm:$0xff] %vm1096_vm9, %v1055_v4  ;;  %v1675_v4 = vshll.u32 %v3825_v54, 16  ;;  %v1681_v10 = vrot.slane %v1679_v47, 4 }
  0xf6   : > { %1776 = vrot.lane.b32.xlu0 %v3483_v36, %s2741_s21  ;;  %v1315_v44 = vpop.permute.xlu1 %1314 }
  0xf7   : > { %1352 = vst.msk [vmem:[#allocation3 + $0x58] sm:$0xff] %vm1340_vm10, %v1315_v44  ;;  %v1858_v44 = vld [vmem:[#allocation3 + $0x40] sm:$0xff] }
  0xf8   : > { %v1297_v3 = vpop.permute.xlu0 %1296  ;;  %1794 = vrot.lane.b32.xlu1 %v3522_v28, %s2741_s21  ;;  %2531 = vmatprep.mubr.bf16.mxu1 %v1858_v44 }
  0xf9   : > { %1343 = vst.msk [vmem:[#allocation3 + $0x10] sm:$0xff] %vm1340_vm10, %v1297_v3  ;;  %v1850_v3 = vld [vmem:[#allocation3] sm:$0xff]  ;;  %v1851_v34 = vld [vmem:[#allocation3 + $0x8] sm:$0xff] }
  0xfa   : > { %1060 = vrot.lane.b32.xlu0 %v3474_v24, %s2736_s10  ;;  %v1383_v53 = vpop.permute.xlu1 %1382  ;;  %v1428_v24 = vshrl.u32 %v3745_v31, 16  ;;  %v3847_v31 = vcombine.low %v1523_v50, %v1526_v55  ;;  %2515 = vmatprep.mubr.bf16.mxu0 %v1850_v3 }
  0xfb   : > { %1421 = vst.msk [vmem:[#allocation3 + $0x50] sm:$0xff] %vm1410_vm11, %v1383_v53 }
  0xfc   : > { %v1299_v40 = vpop.permute.xlu0 %1298  ;;  %1078 = vrot.lane.b32.xlu1 %v3542_v62, %s2736_s10  ;;  %v1430_v25 = vrot.slane %v1428_v24, 4  ;;  %v1677_v24 = vrot.slane %v1675_v4, 5 }
  0xfd   : > { %1344 = vst.msk [vmem:[#allocation3 + $0x18] sm:$0xff] %vm1340_vm10, %v1299_v40  ;;  %v1668_v40 = vrot.slane %v1666_v58, 4 }
  0xfe   : > { %1778 = vrot.lane.b32.xlu0 %v3556_v5, %s2741_s21  ;;  %v1385_v0 = vpop.permute.xlu1 %1384  ;;  %v1434_v26 = vor.u32 %v1433_v41, %v1430_v25 }
  0xff   : > { %1422 = vst.msk [vmem:[#allocation3 + $0x58] sm:$0xff] %vm1410_vm11, %v1385_v0  ;;  %v499_v0 = vld [vmem:[#allocation2 + $0xd4] sm:$0x1] }
 0x100   : > { %v1367_v8 = vpop.permute.xlu0 %1366  ;;  %1320 = vrot.lane.b32.xlu1 %v3470_v45, %s2735_s9  ;;  %v2649_v45 = vld [vmem:[%s4122_s2 + $0x18] sm:$0xff]   ;;  %v1685_v25 = vshll.u32 %v499_v0, 16  ;;  %v1763_v22 = vrot.slane %v499_v0, 5 }
 0x101   : > { %1413 = vst.msk [vmem:[#allocation3 + $0x10] sm:$0xff] %vm1410_vm11, %v1367_v8  ;;  %2505 = vmatprep.subr.bf16.mxu0 %v2649_v45  ;;  %2550 = vmatprep.subr.bf16.mxu1 %v2649_v45  ;;  %v1682_v8 = vor.u32 %v1681_v10, %v1677_v24 }
 0x102   : > { %1062 = vrot.lane.b32.xlu0 %v3546_v11, %s2736_s10  ;;  %v1475_v29 = vpop.permute.xlu1 %1474  ;;  %2506 = vmatpush3.bf16.msra.mxu0 %v2649_v45 }
 0x103   : > { %1513 = vst.msk [vmem:[#allocation3 + $0x50] sm:$0xff] %vm1502_vm12, %v1475_v29  ;;  %2558 = vmatpush3.bf16.msra.mxu1 %v2649_v45  ;;  %2507 = vmatprep.subr.bf16.mxu0 %v2650_v17  ;;  %v1683_v42 = vrot.slane %v1682_v8, 4  ;;  %v1687_v45 = vrot.slane %v1685_v25, 5 }
 0x104   : > { %v1369_v12 = vpop.permute.xlu0 %1368  ;;  %1322 = vrot.lane.b32.xlu1 %v3522_v28, %s2735_s9  ;;  %2551 = vmatprep.subr.bf16.mxu1 %v2650_v17 }
 0x105   : > { %1414 = vst.msk [vmem:[#allocation3 + $0x18] sm:$0xff] %vm1410_vm11, %v1369_v12  ;;  %v4162_v12 = vld [vmem:[#allocation8_spill] sm:$0xff]  ;;  %v1688_v15 = vsel %vm2986_vm8, %v1683_v42, %v1687_v45 }
 0x106   : > { %1304 = vrot.lane.b32.xlu0 %v3483_v36, %s2735_s9  ;;  %v1477_v37 = vpop.permute.xlu1 %1476  ;;  %v1435_v36 = vrot.slane %v1434_v26, 4  ;;  %2508 = vmatpush3.bf16.msra.mxu0 %v2650_v17 }
 0x107   : > { %1514 = vst.msk [vmem:[#allocation3 + $0x58] sm:$0xff] %vm1502_vm12, %v1477_v37  ;;  %2559 = vmatpush3.bf16.msra.mxu1 %v2650_v17  ;;  %v1760_v37 = vrot.slane %v3825_v54, 5 }
 0x108   : > { %v1459_v27 = vpop.permute.xlu0 %1458  ;;  %1390 = vrot.lane.b32.xlu1 %v3479_v23, %s2734_s8  ;;  %v2651_v23 = vld [vmem:[%s4122_s2 + $0x28] sm:$0xff]   ;;  %v1440_v61 = vsel %vm2986_vm8, %v1435_v36, %v1439_v14  ;;  %v2458_v36 = vrot.slane %v3823_v63, 9 }
 0x109   : > { %1505 = vst.msk [vmem:[#allocation3 + $0x10] sm:$0xff] %vm1502_vm12, %v1459_v27  ;;  %2509 = vmatprep.subr.bf16.mxu0 %v2651_v23  ;;  %2552 = vmatprep.subr.bf16.mxu1 %v2651_v23  ;;  %v3816_v43 = vcombine.low %v1440_v61, %v1450_v32  ;;  %v1762_v19 = vrot.slane %v1760_v37, 4  ;;  %v4165_v63 = vld [vmem:[#allocation9_spill] sm:$0xff] }
 0x10a   : > { %1306 = vrot.lane.b32.xlu0 %v3556_v5, %s2735_s9  ;;  %v1551_v30 = vpop.permute.xlu1 %1550  ;;  %2510 = vmatpush3.bf16.msra.mxu0 %v2651_v23  ;;  %v1761_v51 = vsel %vm2944_vm7, %v2458_v36, %v1760_v37  ;;  %s2743_s9 = smov [#allocation4]  }
 0x10b   : > { %1589 = vst.msk [vmem:[#allocation3 + $0x50] sm:$0xff] %vm1578_vm13, %v1551_v30  ;;  %2560 = vmatpush3.bf16.msra.mxu1 %v2651_v23  ;;  %2511 = vmatprep.subr.bf16.mxu0 %v2652_v48  ;;  %v1764_v61 = vsel %vm2944_vm7, %v1762_v19, %v1763_v22  ;;  %s2658_s22 = sshll.u32 %s2743_s9, 4  ;;  %s2659_s22 = int_to_ptr.vmem [resolvable:$false] %s2658_s22 }
 0x10c   : > { %v1461_v52 = vpop.permute.xlu0 %1460  ;;  %1392 = vrot.lane.b32.xlu1 %v3791_v57, %s2734_s8  ;;  %2553 = vmatprep.subr.bf16.mxu1 %v2652_v48  ;;  %s2660_s24 = scalar_lea.vmem %s2659_s22, 8192 }
 0x10d   : > { %1506 = vst.msk [vmem:[#allocation3 + $0x18] sm:$0xff] %vm1502_vm12, %v1461_v52 }
 0x10e   : > { %1374 = vrot.lane.b32.xlu0 %v4159_v60, %s2734_s8  ;;  %v1553_v2 = vpop.permute.xlu1 %1552  ;;  %2512 = vmatpush3.bf16.msra.mxu0 %v2652_v48 }
 0x10f   : > { %1590 = vst.msk [vmem:[#allocation3 + $0x58] sm:$0xff] %vm1578_vm13, %v1553_v2  ;;  %2561 = vmatpush3.bf16.msra.mxu1 %v2652_v48  ;;  %v2459_v48 = vcombine.low %v1761_v51, %v1764_v61 }
 0x110   : > { %v1535_v49 = vpop.permute.xlu0 %1534  ;;  %1482 = vrot.lane.b32.xlu1 %v3542_v62, %s2737_s11  ;;  %v2653_v62 = vld [vmem:[%s4122_s2 + $0x38] sm:$0xff]  }
 0x111   : > { %1581 = vst.msk [vmem:[#allocation3 + $0x10] sm:$0xff] %vm1578_vm13, %v1535_v49  ;;  %2513 = vmatprep.subr.bf16.mxu0 %v2653_v62  ;;  %2554 = vmatprep.subr.bf16.mxu1 %v2653_v62 }
 0x112   : > { %1376 = vrot.lane.b32.xlu0 %v4160_v59, %s2734_s8  ;;  %v1621_v9 = vpop.permute.xlu1 %1620  ;;  %2514 = vmatpush3.bf16.msra.mxu0 %v2653_v62  ;;  %s291_s8 = sand.u32 1, %s2716_s16  }
 0x113   : > { %1659 = vst.msk [vmem:[#allocation3 + $0x50] sm:$0xff] %vm1648_vm14, %v1621_v9  ;;  %2562 = vmatpush3.bf16.msra.mxu1 %v2653_v62  ;;  %s4073_s6 = scalar_lea.sflag [#allocation5], %s291_s8 }
 0x114   : > { %v1537_v60 = vpop.permute.xlu0 %1536  ;;  %1484 = vrot.lane.b32.xlu1 %v3816_v43, %s2737_s11 }
 0x115   : > { %1582 = vst.msk [vmem:[#allocation3 + $0x18] sm:$0xff] %vm1578_vm13, %v1537_v60  ;;  %2516 = vmatmul.mubr.bf16.vlgmr.msra.gmra.mrb[0].mxu0 %v1851_v34 }
 0x116   : > { %1466 = vrot.lane.b32.xlu0 %v3546_v11, %s2737_s11  ;;  %v1623_v21 = vpop.permute.xlu1 %1622  ;;  %v1671_v11 = vrot.slane %v1669_v18, 5  ;;  %2532 = vmatmul.mubr.bf16.vlgmr.msra.gmra.mrb[0].mxu1 %v1859_v6 }
 0x117   : > { %1660 = vst.msk [vmem:[#allocation3 + $0x58] sm:$0xff] %vm1648_vm14, %v1623_v21 }
 0x118   : > { %v1605_v53 = vpop.permute.xlu0 %1604  ;;  %1558 = vrot.lane.b32.xlu1 %v3522_v28, %s2738_s12  ;;  %v1672_v35 = vor.u32 %v1671_v11, %v1668_v40 }
 0x119   : > { %1651 = vst.msk [vmem:[#allocation3 + $0x10] sm:$0xff] %vm1648_vm14, %v1605_v53 }
 0x11a   : > { %1468 = vrot.lane.b32.xlu0 %v4161_v46, %s2737_s11  ;;  %v1713_v16 = vpop.permute.xlu1 %1712  ;;  %v1673_v29 = vrot.slane %v1672_v35, 4 }
 0x11b   : > { %1751 = vst.msk [vmem:[#allocation3 + $0x50] sm:$0xff] %vm1740_vm15, %v1713_v16 }
 0x11c   : > { %v1607_v28 = vpop.permute.xlu0 %1606  ;;  %1560 = vrot.lane.b32.xlu1 %v3847_v31, %s2738_s12  ;;  %v1678_v13 = vsel %vm2986_vm8, %v1673_v29, %v1677_v24 }
 0x11d   : > { %1652 = vst.msk [vmem:[#allocation3 + $0x18] sm:$0xff] %vm1648_vm14, %v1607_v28 }
 0x11e   : > { %1542 = vrot.lane.b32.xlu0 %v3556_v5, %s2738_s12  ;;  %v1715_v41 = vpop.permute.xlu1 %1714 }
 0x11f   : > { %1752 = vst.msk [vmem:[#allocation3 + $0x58] sm:$0xff] %vm1740_vm15, %v1715_v41 }
 0x120   : > { %v1697_v14 = vpop.permute.xlu0 %1696  ;;  %1628 = vrot.lane.b32.xlu1 %v3791_v57, %s2739_s13  ;;  %v2457_v57 = vcombine.low %v1678_v13, %v1688_v15 }
 0x121   : > { %1743 = vst.msk [vmem:[#allocation3 + $0x10] sm:$0xff] %vm1740_vm15, %v1697_v14 }
 0x122   : > { %1544 = vrot.lane.b32.xlu0 %v4162_v12, %s2738_s12  ;;  %v1789_v26 = vpop.permute.xlu1 %1788 }
 0x123   : > { %1827 = vst.msk [vmem:[#allocation3 + $0x50] sm:$0xff] %vm1816_vm0, %v1789_v26 }
 0x124   : > { %v1699_v5 = vpop.permute.xlu0 %1698  ;;  %1844 = vst.msk [vmem:[#allocation3 + $0x50] sm:$0xff] %vm1833_vm1, %v2742_v39  ;;  %1630 = vrot.lane.b32.xlu1 %v2456_v38, %s2739_s13 }
 0x125   : > { %1744 = vst.msk [vmem:[#allocation3 + $0x18] sm:$0xff] %vm1740_vm15, %v1699_v5 }
 0x126   : > { %1612 = vrot.lane.b32.xlu0 %v4160_v59, %s2739_s13  ;;  %v1073_v17 = vpop.permute.xlu1 %1072 }
 0x127   : > { %1109 = vst.msk [vmem:[#allocation3 + $0x60] sm:$0xff] %vm1096_vm9, %v1073_v17 }
 0x128   : > { %v1773_v27 = vpop.permute.xlu0 %1772  ;;  %1720 = vrot.lane.b32.xlu1 %v3816_v43, %s2740_s14 }
 0x129   : > { %1819 = vst.msk [vmem:[#allocation3 + $0x10] sm:$0xff] %vm1816_vm0, %v1773_v27 }
 0x12a   : > { %1836 = vst.msk [vmem:[#allocation3 + $0x10] sm:$0xff] %vm1833_vm1, %v2742_v39  ;;  %1614 = vrot.lane.b32.xlu0 %v4163_v33, %s2739_s13  ;;  %v1791_v30 = vpop.permute.xlu1 %1790  ;;  %s2385_s13 = sshll.u32 %s291_s8, 8 }
 0x12b   : > { %1828 = vst.msk [vmem:[#allocation3 + $0x58] sm:$0xff] %vm1816_vm0, %v1791_v30  ;;  %v1860_v23 = vld [vmem:[#allocation3 + $0x50] sm:$0xff] }
 0x12c   : > { %v1057_v52 = vpop.permute.xlu0 %1056  ;;  %1845 = vst.msk [vmem:[#allocation3 + $0x58] sm:$0xff] %vm1833_vm1, %v2742_v39  ;;  %1722 = vrot.lane.b32.xlu1 %v2457_v57, %s2740_s14  ;;  %2535 = vmatprep.mubr.bf16.mxu1 %v1860_v23 }
 0x12d   : > { %1101 = vst.msk [vmem:[#allocation3 + $0x20] sm:$0xff] %vm1096_vm9, %v1057_v52 }
 0x12e   : > { %1704 = vrot.lane.b32.xlu0 %v4161_v46, %s2740_s14  ;;  %v1075_v32 = vpop.permute.xlu1 %1074 }
 0x12f   : > { %1110 = vst.msk [vmem:[#allocation3 + $0x68] sm:$0xff] %vm1096_vm9, %v1075_v32 }
 0x130   : > { %v1775_v2 = vpop.permute.xlu0 %1774  ;;  %1796 = vrot.lane.b32.xlu1 %v3847_v31, %s2741_s21 }
 0x131   : > { %1820 = vst.msk [vmem:[#allocation3 + $0x18] sm:$0xff] %vm1816_vm0, %v1775_v2  ;;  %v1852_v49 = vld [vmem:[#allocation3 + $0x10] sm:$0xff] }
 0x132   : > { %1837 = vst.msk [vmem:[#allocation3 + $0x18] sm:$0xff] %vm1833_vm1, %v2742_v39  ;;  %1706 = vrot.lane.b32.xlu0 %v4164_v56, %s2740_s14  ;;  %v1317_v43 = vpop.permute.xlu1 %1316  ;;  %2519 = vmatprep.mubr.bf16.mxu0 %v1852_v49  ;;  %s4001_s14 = scalar_lea.vmem [#allocation4], %s2385_s13 }
 0x133   : > { %1353 = vst.msk [vmem:[#allocation3 + $0x60] sm:$0xff] %vm1340_vm10, %v1317_v43  ;;  %v1861_v7 = vld [vmem:[#allocation3 + $0x58] sm:$0xff]  ;;  %s2244_s29 = sshll.u32 %s4001_s14, 4  ;;  %s4067_s29 = int_to_ptr.vmem [resolvable:$true] %s2244_s29 }
 0x134   : > { %v1059_v20 = vpop.permute.xlu0 %1058  ;;  %1798 = vrot.lane.b32.xlu1 %v2459_v48, %s2741_s21  ;;  %2536 = vmatmul.mubr.bf16.gmra.mrb[4].mxu1 %v1861_v7  ;;  %s2654_s7 = scalar_lea.vmem %s4067_s29, 4096  ;;  %p2661_p1 = scmp.lt.s32.totalorder %s4067_s29, %s2659_s22 }
 0x135   : > { %1102 = vst.msk [vmem:[#allocation3 + $0x28] sm:$0xff] %vm1096_vm9, %v1059_v20  ;;  %p2655_p12 = scmp.ne.s32.totalorder %s4067_s29, %s2654_s7  ;;  %p2662_p2 = scmp.lt.s32.totalorder %s2660_s24, %s2654_s7 }
 0x136   : > { %1780 = vrot.lane.b32.xlu0 %v4162_v12, %s2741_s21  ;;  %v1319_v1 = vpop.permute.xlu1 %1318 }
 0x137   : > { %1354 = vst.msk [vmem:[#allocation3 + $0x68] sm:$0xff] %vm1340_vm10, %v1319_v1  ;;  %p2656_p13 = pnand %p2655_p12, %p2810_p4  ;;  %p2663_p3 = por %p2662_p2, %p2661_p1 }
 0x138   : > { %v1301_v59 = vpop.permute.xlu0 %1300 }
 0x139   : > { %1345 = vst.msk [vmem:[#allocation3 + $0x20] sm:$0xff] %vm1340_vm10, %v1301_v59  ;;  %v1853_v9 = vld [vmem:[#allocation3 + $0x18] sm:$0xff]  ;;  %p2657_p0 = pneg %p2656_p13 }
 0x13a   : > { %1782 = vrot.lane.b32.xlu0 %v4165_v63, %s2741_s21  ;;  %v1387_v54 = vpop.permute.xlu1 %1386  ;;  %2520 = vmatmul.mubr.bf16.gmra.mrb[4].mxu0 %v1853_v9  ;;  %s2474_s21 = sshll.u32 %s2724_s18, 12 }
 0x13b   : > { %1423 = vst.msk [vmem:[#allocation3 + $0x60] sm:$0xff] %vm1410_vm11, %v1387_v54  ;;  %s4064_s18 = scalar_lea.hbm %s4124_s4, %s2474_s21  ;;  %p2664_p5 = pnand %p2663_p3, %p2657_p0 }
 0x13c   : > { %v1303_v62 = vpop.permute.xlu0 %1302 }
 0x13d   : > { %1346 = vst.msk [vmem:[#allocation3 + $0x28] sm:$0xff] %vm1340_vm10, %v1303_v62 }
 0x13e   : > { %v1389_v60 = vpop.permute.xlu1 %1388 }
 0x13f   : > { %1424 = vst.msk [vmem:[#allocation3 + $0x68] sm:$0xff] %vm1410_vm11, %v1389_v60  ;;  %v3992_v60 = vld [vmem:[%s4123_s3] ss:$0 sm:$0xff] }
 0x140   : > { %v1371_v50 = vpop.permute.xlu0 %1370 }
 0x141   : > { %1415 = vst.msk [vmem:[#allocation3 + $0x20] sm:$0xff] %vm1410_vm11, %v1371_v50 }
 0x142   : > { %v1479_v55 = vpop.permute.xlu1 %1478 }
 0x143   : > { %1515 = vst.msk [vmem:[#allocation3 + $0x60] sm:$0xff] %vm1502_vm12, %v1479_v55 }
 0x144   : > { %v1373_v58 = vpop.permute.xlu0 %1372 }
 0x145   : > { %1416 = vst.msk [vmem:[#allocation3 + $0x28] sm:$0xff] %vm1410_vm11, %v1373_v58 }
 0x146   : > { %v1481_v18 = vpop.permute.xlu1 %1480 }
 0x147   : > { %1516 = vst.msk [vmem:[#allocation3 + $0x68] sm:$0xff] %vm1502_vm12, %v1481_v18 }
 0x148   : > { %v1463_v47 = vpop.permute.xlu0 %1462 }
 0x149   : > { %1507 = vst.msk [vmem:[#allocation3 + $0x20] sm:$0xff] %vm1502_vm12, %v1463_v47 }
 0x14a   : > { %v1555_v4 = vpop.permute.xlu1 %1554 }
 0x14b   : > { %1591 = vst.msk [vmem:[#allocation3 + $0x60] sm:$0xff] %vm1578_vm13, %v1555_v4 }
 0x14c   : > { %v1465_v44 = vpop.permute.xlu0 %1464 }
 0x14d   : > { %1508 = vst.msk [vmem:[#allocation3 + $0x28] sm:$0xff] %vm1502_vm12, %v1465_v44 }
 0x14e   : > { %v1557_v21 = vpop.permute.xlu1 %1556 }
 0x14f   : > { %1592 = vst.msk [vmem:[#allocation3 + $0x68] sm:$0xff] %vm1578_vm13, %v1557_v21 }
 0x150   : > { %v1539_v3 = vpop.permute.xlu0 %1538 }
 0x151   : > { %1583 = vst.msk [vmem:[#allocation3 + $0x20] sm:$0xff] %vm1578_vm13, %v1539_v3 }
 0x152   : > { %v1625_v53 = vpop.permute.xlu1 %1624 }
 0x153   : > { %1661 = vst.msk [vmem:[#allocation3 + $0x60] sm:$0xff] %vm1648_vm14, %v1625_v53 }
 0x154   : > { %v1541_v31 = vpop.permute.xlu0 %1540 }
 0x155   : > { %1584 = vst.msk [vmem:[#allocation3 + $0x28] sm:$0xff] %vm1578_vm13, %v1541_v31 }
 0x156   : > { %v1627_v34 = vpop.permute.xlu1 %1626 }
 0x157   : > { %1662 = vst.msk [vmem:[#allocation3 + $0x68] sm:$0xff] %vm1648_vm14, %v1627_v34 }
 0x158   : > { %v1609_v6 = vpop.permute.xlu0 %1608 }
 0x159   : > { %1653 = vst.msk [vmem:[#allocation3 + $0x20] sm:$0xff] %vm1648_vm14, %v1609_v6 }
 0x15a   : > { %v1717_v40 = vpop.permute.xlu1 %1716 }
 0x15b   : > { %1753 = vst.msk [vmem:[#allocation3 + $0x60] sm:$0xff] %vm1740_vm15, %v1717_v40 }
 0x15c   : > { %v1611_v11 = vpop.permute.xlu0 %1610 }
 0x15d   : > { %1654 = vst.msk [vmem:[#allocation3 + $0x28] sm:$0xff] %vm1648_vm14, %v1611_v11 }
 0x15e   : > { %v1719_v24 = vpop.permute.xlu1 %1718 }
 0x15f   : > { %1754 = vst.msk [vmem:[#allocation3 + $0x68] sm:$0xff] %vm1740_vm15, %v1719_v24 }
 0x160   : > { %v1701_v10 = vpop.permute.xlu0 %1700 }
 0x161   : > { %1745 = vst.msk [vmem:[#allocation3 + $0x20] sm:$0xff] %vm1740_vm15, %v1701_v10 }
 0x162   : > { %v1793_v46 = vpop.permute.xlu1 %1792 }
 0x163   : > { %1829 = vst.msk [vmem:[#allocation3 + $0x60] sm:$0xff] %vm1816_vm0, %v1793_v46 }
 0x164   : > { %v1703_v16 = vpop.permute.xlu0 %1702  ;;  %1846 = vst.msk [vmem:[#allocation3 + $0x60] sm:$0xff] %vm1833_vm1, %v2742_v39 }
 0x165   : > { %1746 = vst.msk [vmem:[#allocation3 + $0x28] sm:$0xff] %vm1740_vm15, %v1703_v16 }
 0x166   : > { %v1077_v0 = vpop.permute.xlu1 %1076 }
 0x167   : > { %1111 = vst.msk [vmem:[#allocation3 + $0x70] sm:$0xff] %vm1096_vm9, %v1077_v0 }
 0x168   : > { %v1777_v28 = vpop.permute.xlu0 %1776 }
 0x169   : > { %1821 = vst.msk [vmem:[#allocation3 + $0x20] sm:$0xff] %vm1816_vm0, %v1777_v28 }
 0x16a   : > { %1838 = vst.msk [vmem:[#allocation3 + $0x20] sm:$0xff] %vm1833_vm1, %v2742_v39  ;;  %v1795_v35 = vpop.permute.xlu1 %1794 }
 0x16b   : > { %1830 = vst.msk [vmem:[#allocation3 + $0x68] sm:$0xff] %vm1816_vm0, %v1795_v35  ;;  %v1862_v8 = vld [vmem:[#allocation3 + $0x60] sm:$0xff] }
 0x16c   : > { %v1061_v25 = vpop.permute.xlu0 %1060  ;;  %1847 = vst.msk [vmem:[#allocation3 + $0x68] sm:$0xff] %vm1833_vm1, %v2742_v39  ;;  %2539 = vmatprep.mubr.bf16.mxu1 %v1862_v8 }
 0x16d   : > { %1103 = vst.msk [vmem:[#allocation3 + $0x30] sm:$0xff] %vm1096_vm9, %v1061_v25 }
 0x16e   : > { %v1079_v41 = vpop.permute.xlu1 %1078 }
 0x16f   : > { %1112 = vst.msk [vmem:[#allocation3 + $0x78] sm:$0xff] %vm1096_vm9, %v1079_v41 }
 0x170   : > { %v1779_v14 = vpop.permute.xlu0 %1778 }
 0x171   : > { %1822 = vst.msk [vmem:[#allocation3 + $0x28] sm:$0xff] %vm1816_vm0, %v1779_v14  ;;  %v1854_v38 = vld [vmem:[#allocation3 + $0x20] sm:$0xff] }
 0x172   : > { %1839 = vst.msk [vmem:[#allocation3 + $0x28] sm:$0xff] %vm1833_vm1, %v2742_v39  ;;  %v1321_v29 = vpop.permute.xlu1 %1320  ;;  %2523 = vmatprep.mubr.bf16.mxu0 %v1854_v38 }
 0x173   : > { %1355 = vst.msk [vmem:[#allocation3 + $0x70] sm:$0xff] %vm1340_vm10, %v1321_v29  ;;  %v1863_v42 = vld [vmem:[#allocation3 + $0x68] sm:$0xff] }
 0x174   : > { %v1063_v45 = vpop.permute.xlu0 %1062  ;;  %2540 = vmatmul.mubr.bf16.gmra.mrb[8].mxu1 %v1863_v42 }
 0x175   : > { %1104 = vst.msk [vmem:[#allocation3 + $0x38] sm:$0xff] %vm1096_vm9, %v1063_v45 }
 0x176   : > { %v1323_v12 = vpop.permute.xlu1 %1322 }
 0x177   : > { %1356 = vst.msk [vmem:[#allocation3 + $0x78] sm:$0xff] %vm1340_vm10, %v1323_v12 }
 0x178   : > { %v1305_v26 = vpop.permute.xlu0 %1304 }
 0x179   : > { %1347 = vst.msk [vmem:[#allocation3 + $0x30] sm:$0xff] %vm1340_vm10, %v1305_v26  ;;  %v1855_v5 = vld [vmem:[#allocation3 + $0x28] sm:$0xff] }
 0x17a   : > { %v1391_v13 = vpop.permute.xlu1 %1390  ;;  %2524 = vmatmul.mubr.bf16.gmra.mrb[8].mxu0 %v1855_v5 }
 0x17b   : > { %1425 = vst.msk [vmem:[#allocation3 + $0x70] sm:$0xff] %vm1410_vm11, %v1391_v13 }
 0x17c   : > { %v1307_v15 = vpop.permute.xlu0 %1306 }
 0x17d   : > { %1348 = vst.msk [vmem:[#allocation3 + $0x38] sm:$0xff] %vm1340_vm10, %v1307_v15 }
 0x17e   : > { %v1393_v37 = vpop.permute.xlu1 %1392 }
 0x17f   : > { %1426 = vst.msk [vmem:[#allocation3 + $0x78] sm:$0xff] %vm1410_vm11, %v1393_v37 }
 0x180   : > { %v1375_v17 = vpop.permute.xlu0 %1374 }
 0x181   : > { %1417 = vst.msk [vmem:[#allocation3 + $0x30] sm:$0xff] %vm1410_vm11, %v1375_v17 }
 0x182   : > { %v1483_v27 = vpop.permute.xlu1 %1482 }
 0x183   : > { %1517 = vst.msk [vmem:[#allocation3 + $0x70] sm:$0xff] %vm1502_vm12, %v1483_v27 }
 0x184   : > { %v1377_v57 = vpop.permute.xlu0 %1376 }
 0x185   : > { %1418 = vst.msk [vmem:[#allocation3 + $0x38] sm:$0xff] %vm1410_vm11, %v1377_v57 }
 0x186   : > { %v1485_v36 = vpop.permute.xlu1 %1484 }
 0x187   : > { %1518 = vst.msk [vmem:[#allocation3 + $0x78] sm:$0xff] %vm1502_vm12, %v1485_v36 }
 0x188   : > { %v1467_v19 = vpop.permute.xlu0 %1466 }
 0x189   : > { %1509 = vst.msk [vmem:[#allocation3 + $0x30] sm:$0xff] %vm1502_vm12, %v1467_v19 }
 0x18a   : > { %v1559_v22 = vpop.permute.xlu1 %1558 }
 0x18b   : > { %1593 = vst.msk [vmem:[#allocation3 + $0x70] sm:$0xff] %vm1578_vm13, %v1559_v22 }
 0x18c   : > { %v1469_v33 = vpop.permute.xlu0 %1468 }
 0x18d   : > { %1510 = vst.msk [vmem:[#allocation3 + $0x38] sm:$0xff] %vm1502_vm12, %v1469_v33 }
 0x18e   : > { %v1561_v30 = vpop.permute.xlu1 %1560 }
 0x18f   : > { %1594 = vst.msk [vmem:[#allocation3 + $0x78] sm:$0xff] %vm1578_vm13, %v1561_v30 }
 0x190   : > { %v1543_v23 = vpop.permute.xlu0 %1542 }
 0x191   : > { %1585 = vst.msk [vmem:[#allocation3 + $0x30] sm:$0xff] %vm1578_vm13, %v1543_v23 }
 0x192   : > { %v1629_v52 = vpop.permute.xlu1 %1628 }
 0x193   : > { %1663 = vst.msk [vmem:[#allocation3 + $0x70] sm:$0xff] %vm1648_vm14, %v1629_v52 }
 0x194   : > { %v1545_v51 = vpop.permute.xlu0 %1544 }
 0x195   : > { %1586 = vst.msk [vmem:[#allocation3 + $0x38] sm:$0xff] %vm1578_vm13, %v1545_v51 }
 0x196   : > { %v1631_v61 = vpop.permute.xlu1 %1630 }
 0x197   : > { %1664 = vst.msk [vmem:[#allocation3 + $0x78] sm:$0xff] %vm1648_vm14, %v1631_v61 }
 0x198   : > { %v1613_v32 = vpop.permute.xlu0 %1612 }
 0x199   : > { %1655 = vst.msk [vmem:[#allocation3 + $0x30] sm:$0xff] %vm1648_vm14, %v1613_v32 }
 0x19a   : > { %v1721_v2 = vpop.permute.xlu1 %1720 }
 0x19b   : > { %1755 = vst.msk [vmem:[#allocation3 + $0x70] sm:$0xff] %vm1740_vm15, %v1721_v2 }
 0x19c   : > { %v1615_v48 = vpop.permute.xlu0 %1614 }
 0x19d   : > { %1656 = vst.msk [vmem:[#allocation3 + $0x38] sm:$0xff] %vm1648_vm14, %v1615_v48 }
 0x19e   : > { %v1723_v49 = vpop.permute.xlu1 %1722 }
 0x19f   : > { %1756 = vst.msk [vmem:[#allocation3 + $0x78] sm:$0xff] %vm1740_vm15, %v1723_v49 }
 0x1a0   : > { %v1705_v56 = vpop.permute.xlu0 %1704 }
 0x1a1   : > { %1747 = vst.msk [vmem:[#allocation3 + $0x30] sm:$0xff] %vm1740_vm15, %v1705_v56 }
 0x1a2   : > { %v1797_v43 = vpop.permute.xlu1 %1796 }
 0x1a3   : > { %1831 = vst.msk [vmem:[#allocation3 + $0x70] sm:$0xff] %vm1816_vm0, %v1797_v43 }
 0x1a4   : > { %v1707_v7 = vpop.permute.xlu0 %1706  ;;  %1848 = vst.msk [vmem:[#allocation3 + $0x70] sm:$0xff] %vm1833_vm1, %v2742_v39 }
 0x1a5   : > { %1748 = vst.msk [vmem:[#allocation3 + $0x38] sm:$0xff] %vm1740_vm15, %v1707_v7 }
 0x1a6   : > { %v1799_v20 = vpop.permute.xlu1 %1798 }
 0x1a7   : > { %1832 = vst.msk [vmem:[#allocation3 + $0x78] sm:$0xff] %vm1816_vm0, %v1799_v20 }
 0x1a8   : > { %v1781_v1 = vpop.permute.xlu0 %1780  ;;  %1849 = vst.msk [vmem:[#allocation3 + $0x78] sm:$0xff] %vm1833_vm1, %v2742_v39 }
 0x1a9   : > { %1823 = vst.msk [vmem:[#allocation3 + $0x30] sm:$0xff] %vm1816_vm0, %v1781_v1 }
 0x1aa   : > { %1840 = vst.msk [vmem:[#allocation3 + $0x30] sm:$0xff] %vm1833_vm1, %v2742_v39 }
 0x1ab   : > { %v1864_v59 = vld [vmem:[#allocation3 + $0x70] sm:$0xff] }
 0x1ac   : > { %v1783_v9 = vpop.permute.xlu0 %1782  ;;  %2543 = vmatprep.mubr.bf16.mxu1 %v1864_v59 }
 0x1ad   : > { %1824 = vst.msk [vmem:[#allocation3 + $0x38] sm:$0xff] %vm1816_vm0, %v1783_v9 }
 0x1ae   : > { %1841 = vst.msk [vmem:[#allocation3 + $0x38] sm:$0xff] %vm1833_vm1, %v2742_v39 }
 0x1af   : > { %v1865_v63 = vld [vmem:[#allocation3 + $0x78] sm:$0xff] }
 0x1b0   : > { %2544 = vmatmul.mubr.bf16.gmra.mrb[12].mxu1 %v1865_v63 }
 0x1b1   : > { %v1856_v54 = vld [vmem:[#allocation3 + $0x30] sm:$0xff] }
 0x1b2   : > { %2527 = vmatprep.mubr.bf16.mxu0 %v1856_v54 }
 0x1b5   : > { %v1857_v62 = vld [vmem:[#allocation3 + $0x38] sm:$0xff] }
 0x1b6   : > { %2528 = vmatmul.mubr.bf16.gmra.mrb[12].mxu0 %v1857_v62 }
 0x1e8   : > { %v2517_v50 = vpop.f32.mrb[0].mxu0 }
 0x1e9   : > { %v1980_v55 = vadd.f32 %v2517_v50, %v3992_v60  ;;  %v2533_v58 = vpop.f32.mrb[0].mxu1  ;;  %v1971_v18 = vpop.f32.mrb[1].mxu0 }
 0x1ea   : > { %v2044_v39 = vadd.f32 %v2533_v58, %v3992_v60  ;;  %v1972_v47 = vadd.f32 %v3992_v60, %v1971_v18  ;;  %v2035_v4 = vpop.f32.mrb[1].mxu1  ;;  %v2518_v44 = vpop.f32.mrb[2].mxu0 }
 0x1eb   : > { %vm2100_vm2 = vcmp.gt.f32.partialorder %v1980_v55, 0.0  ;;  %v2132_v21 = vmul.f32 0.1, %v1980_v55  ;;  %v2036_v3 = vadd.f32 %v3992_v60, %v2035_v4  ;;  %v1983_v53 = vadd.f32 %v2518_v44, %v3992_v60  ;;  %v2534_v31 = vpop.f32.mrb[2].mxu1  ;;  %v1974_v34 = vpop.f32.mrb[3].mxu0 }
 0x1ec   : > { %vm2116_vm3 = vcmp.gt.f32.partialorder %v2044_v39, 0.0  ;;  %v2148_v6 = vmul.f32 0.1, %v2044_v39  ;;  %vm2098_vm4 = vcmp.gt.f32.partialorder %v1972_v47, 0.0  ;;  %v2130_v40 = vmul.f32 0.1, %v1972_v47 }
 0x1ed   : > { %v2164_v11 = vsel %vm2100_vm2, %v1980_v55, %v2132_v21  ;;  %vm2114_vm5 = vcmp.gt.f32.partialorder %v2036_v3, 0.0  ;;  %v2146_v24 = vmul.f32 0.1, %v2036_v3  ;;  %vm2101_vm6 = vcmp.gt.f32.partialorder %v1983_v53, 0.0  ;;  %v2038_v10 = vpop.f32.mrb[3].mxu1 }
 0x1ee   : > { %2196 = vst [vmem:[%s4001_s14 + $0x10] sm:$0xff] %v2164_v11  ;;  %v2180_v46 = vsel %vm2116_vm3, %v2044_v39, %v2148_v6  ;;  %v2162_v16 = vsel %vm2098_vm4, %v1972_v47, %v2130_v40  ;;  %v2133_v0 = vmul.f32 0.1, %v1983_v53  ;;  %v2047_v28 = vadd.f32 %v2534_v31, %v3992_v60 }
 0x1ef   : > { %2212 = vst [vmem:[%s4001_s14 + $0x90] sm:$0xff] %v2180_v46  ;;  %2194 = vst [vmem:[%s4001_s14] sm:$0xff] %v2162_v16  ;;  %v2178_v35 = vsel %vm2114_vm5, %v2036_v3, %v2146_v24  ;;  %v1975_v8 = vadd.f32 %v3992_v60, %v1974_v34  ;;  %v2039_v25 = vadd.f32 %v3992_v60, %v2038_v10 }
 0x1f0   : > { %2210 = vst [vmem:[%s4001_s14 + $0x80] sm:$0xff] %v2178_v35  ;;  %v2165_v41 = vsel %vm2101_vm6, %v1983_v53, %v2133_v0  ;;  %vm2117_vm7 = vcmp.gt.f32.partialorder %v2047_v28, 0.0  ;;  %v2149_v14 = vmul.f32 0.1, %v2047_v28 }
 0x1f1   : > { %2197 = vst [vmem:[%s4001_s14 + $0x18] sm:$0xff] %v2165_v41  ;;  %vm2099_vm8 = vcmp.gt.f32.partialorder %v1975_v8, 0.0  ;;  %v2131_v38 = vmul.f32 0.1, %v1975_v8  ;;  %vm2115_vm9 = vcmp.gt.f32.partialorder %v2039_v25, 0.0 }
 0x1f2   : > { %v2147_v29 = vmul.f32 0.1, %v2039_v25  ;;  %v2181_v42 = vsel %vm2117_vm7, %v2047_v28, %v2149_v14 }
 0x1f3   : > { %2213 = vst [vmem:[%s4001_s14 + $0x98] sm:$0xff] %v2181_v42  ;;  %v2163_v45 = vsel %vm2099_vm8, %v1975_v8, %v2131_v38 }
 0x1f4   : > { %v2179_v12 = vsel %vm2115_vm9, %v2039_v25, %v2147_v29  ;;  %2195 = vst [vmem:[%s4001_s14 + $0x8] sm:$0xff] %v2163_v45 }
 0x1f5   : > { %2211 = vst [vmem:[%s4001_s14 + $0x88] sm:$0xff] %v2179_v12 }
 0x207   : > { %v2537_v26 = vpop.f32.mrb[4].mxu1 }
 0x208   : > { %v2060_v5 = vadd.f32 %v2537_v26, %v3992_v60  ;;  %v2051_v13 = vpop.f32.mrb[5].mxu1 }
 0x209   : > { %v2052_v15 = vadd.f32 %v3992_v60, %v2051_v13  ;;  %v2538_v37 = vpop.f32.mrb[6].mxu1 }
 0x20a   : > { %vm2120_vm10 = vcmp.gt.f32.partialorder %v2060_v5, 0.0  ;;  %v2152_v17 = vmul.f32 0.1, %v2060_v5  ;;  %v2063_v27 = vadd.f32 %v2538_v37, %v3992_v60  ;;  %v2054_v57 = vpop.f32.mrb[7].mxu1 }
 0x20b   : > { %vm2118_vm11 = vcmp.gt.f32.partialorder %v2052_v15, 0.0  ;;  %v2150_v36 = vmul.f32 0.1, %v2052_v15  ;;  %v2055_v19 = vadd.f32 %v3992_v60, %v2054_v57 }
 0x20c   : > { %v2184_v22 = vsel %vm2120_vm10, %v2060_v5, %v2152_v17  ;;  %vm2121_vm12 = vcmp.gt.f32.partialorder %v2063_v27, 0.0  ;;  %v2153_v33 = vmul.f32 0.1, %v2063_v27 }
 0x20d   : > { %v2521_v30 = vpop.f32.mrb[4].mxu0  ;;  %2216 = vst [vmem:[%s4001_s14 + $0xb0] sm:$0xff] %v2184_v22  ;;  %v2182_v23 = vsel %vm2118_vm11, %v2052_v15, %v2150_v36  ;;  %vm2119_vm13 = vcmp.gt.f32.partialorder %v2055_v19, 0.0  ;;  %v2151_v52 = vmul.f32 0.1, %v2055_v19 }
 0x20e   : > { %v1996_v51 = vadd.f32 %v2521_v30, %v3992_v60  ;;  %v1987_v61 = vpop.f32.mrb[5].mxu0  ;;  %2214 = vst [vmem:[%s4001_s14 + $0xa0] sm:$0xff] %v2182_v23  ;;  %v2185_v32 = vsel %vm2121_vm12, %v2063_v27, %v2153_v33 }
 0x20f   : > { %v1988_v2 = vadd.f32 %v3992_v60, %v1987_v61  ;;  %v2522_v48 = vpop.f32.mrb[6].mxu0  ;;  %2217 = vst [vmem:[%s4001_s14 + $0xb8] sm:$0xff] %v2185_v32  ;;  %v2183_v49 = vsel %vm2119_vm13, %v2055_v19, %v2151_v52 }
 0x210   : > { %vm2104_vm14 = vcmp.gt.f32.partialorder %v1996_v51, 0.0  ;;  %v2136_v56 = vmul.f32 0.1, %v1996_v51  ;;  %v1999_v43 = vadd.f32 %v2522_v48, %v3992_v60  ;;  %v1990_v7 = vpop.f32.mrb[7].mxu0  ;;  %2215 = vst [vmem:[%s4001_s14 + $0xa8] sm:$0xff] %v2183_v49 }
 0x211   : > { %vm2102_vm15 = vcmp.gt.f32.partialorder %v1988_v2, 0.0  ;;  %v2134_v20 = vmul.f32 0.1, %v1988_v2  ;;  %v1991_v1 = vadd.f32 %v3992_v60, %v1990_v7 }
 0x212   : > { %v2168_v59 = vsel %vm2104_vm14, %v1996_v51, %v2136_v56  ;;  %vm2105_vm0 = vcmp.gt.f32.partialorder %v1999_v43, 0.0  ;;  %v2137_v9 = vmul.f32 0.1, %v1999_v43 }
 0x213   : > { %2200 = vst [vmem:[%s4001_s14 + $0x30] sm:$0xff] %v2168_v59  ;;  %v2166_v63 = vsel %vm2102_vm15, %v1988_v2, %v2134_v20  ;;  %vm2103_vm1 = vcmp.gt.f32.partialorder %v1991_v1, 0.0  ;;  %v2135_v54 = vmul.f32 0.1, %v1991_v1 }
 0x214   : > { %2198 = vst [vmem:[%s4001_s14 + $0x20] sm:$0xff] %v2166_v63  ;;  %v2169_v62 = vsel %vm2105_vm0, %v1999_v43, %v2137_v9 }
 0x215   : > { %2201 = vst [vmem:[%s4001_s14 + $0x38] sm:$0xff] %v2169_v62  ;;  %v2167_v50 = vsel %vm2103_vm1, %v1991_v1, %v2135_v54 }
 0x216   : > { %2199 = vst [vmem:[%s4001_s14 + $0x28] sm:$0xff] %v2167_v50 }
 0x247   : > { %v2541_v55 = vpop.f32.mrb[8].mxu1 }
 0x248   : > { %v2076_v58 = vadd.f32 %v2541_v55, %v3992_v60  ;;  %v2067_v18 = vpop.f32.mrb[9].mxu1 }
 0x249   : > { %v2068_v39 = vadd.f32 %v3992_v60, %v2067_v18  ;;  %v2542_v47 = vpop.f32.mrb[10].mxu1 }
 0x24a   : > { %vm2124_vm2 = vcmp.gt.f32.partialorder %v2076_v58, 0.0  ;;  %v2156_v4 = vmul.f32 0.1, %v2076_v58  ;;  %v2079_v44 = vadd.f32 %v2542_v47, %v3992_v60  ;;  %v2070_v21 = vpop.f32.mrb[11].mxu1 }
 0x24b   : > { %vm2122_vm3 = vcmp.gt.f32.partialorder %v2068_v39, 0.0  ;;  %v2154_v3 = vmul.f32 0.1, %v2068_v39  ;;  %v2071_v53 = vadd.f32 %v3992_v60, %v2070_v21 }
 0x24c   : > { %v2188_v31 = vsel %vm2124_vm2, %v2076_v58, %v2156_v4  ;;  %vm2125_vm4 = vcmp.gt.f32.partialorder %v2079_v44, 0.0  ;;  %v2157_v34 = vmul.f32 0.1, %v2079_v44 }
 0x24d   : > { %v2525_v6 = vpop.f32.mrb[8].mxu0  ;;  %2220 = vst [vmem:[%s4001_s14 + $0xd0] sm:$0xff] %v2188_v31  ;;  %v2186_v40 = vsel %vm2122_vm3, %v2068_v39, %v2154_v3  ;;  %vm2123_vm5 = vcmp.gt.f32.partialorder %v2071_v53, 0.0  ;;  %v2155_v11 = vmul.f32 0.1, %v2071_v53 }
 0x24e   : > { %v2012_v24 = vadd.f32 %v2525_v6, %v3992_v60  ;;  %v2003_v10 = vpop.f32.mrb[9].mxu0  ;;  %2218 = vst [vmem:[%s4001_s14 + $0xc0] sm:$0xff] %v2186_v40  ;;  %v2189_v46 = vsel %vm2125_vm4, %v2079_v44, %v2157_v34 }
 0x24f   : > { %v2004_v16 = vadd.f32 %v3992_v60, %v2003_v10  ;;  %v2526_v0 = vpop.f32.mrb[10].mxu0  ;;  %2221 = vst [vmem:[%s4001_s14 + $0xd8] sm:$0xff] %v2189_v46  ;;  %v2187_v28 = vsel %vm2123_vm5, %v2071_v53, %v2155_v11 }
 0x250   : > { %vm2108_vm6 = vcmp.gt.f32.partialorder %v2012_v24, 0.0  ;;  %v2140_v35 = vmul.f32 0.1, %v2012_v24  ;;  %v2015_v8 = vadd.f32 %v2526_v0, %v3992_v60  ;;  %v2006_v25 = vpop.f32.mrb[11].mxu0  ;;  %2219 = vst [vmem:[%s4001_s14 + $0xc8] sm:$0xff] %v2187_v28 }
 0x251   : > { %vm2106_vm7 = vcmp.gt.f32.partialorder %v2004_v16, 0.0  ;;  %v2138_v41 = vmul.f32 0.1, %v2004_v16  ;;  %v2007_v14 = vadd.f32 %v3992_v60, %v2006_v25 }
 0x252   : > { %v2172_v38 = vsel %vm2108_vm6, %v2012_v24, %v2140_v35  ;;  %vm2109_vm8 = vcmp.gt.f32.partialorder %v2015_v8, 0.0  ;;  %v2141_v29 = vmul.f32 0.1, %v2015_v8 }
 0x253   : > { %2204 = vst [vmem:[%s4001_s14 + $0x50] sm:$0xff] %v2172_v38  ;;  %v2170_v42 = vsel %vm2106_vm7, %v2004_v16, %v2138_v41  ;;  %vm2107_vm9 = vcmp.gt.f32.partialorder %v2007_v14, 0.0  ;;  %v2139_v45 = vmul.f32 0.1, %v2007_v14 }
 0x254   : > { %2202 = vst [vmem:[%s4001_s14 + $0x40] sm:$0xff] %v2170_v42  ;;  %v2173_v12 = vsel %vm2109_vm8, %v2015_v8, %v2141_v29 }
 0x255   : > { %2205 = vst [vmem:[%s4001_s14 + $0x58] sm:$0xff] %v2173_v12  ;;  %v2171_v26 = vsel %vm2107_vm9, %v2007_v14, %v2139_v45 }
 0x256   : > { %2203 = vst [vmem:[%s4001_s14 + $0x48] sm:$0xff] %v2171_v26 }
 0x283   : > { %v2545_v5 = vpop.f32.mrb[12].mxu1 }
 0x284   : > { %v2092_v13 = vadd.f32 %v2545_v5, %v3992_v60  ;;  %v2083_v15 = vpop.f32.mrb[13].mxu1 }
 0x285   : > { %v2084_v37 = vadd.f32 %v3992_v60, %v2083_v15  ;;  %v2546_v17 = vpop.f32.mrb[14].mxu1 }
 0x286   : > { %vm2128_vm10 = vcmp.gt.f32.partialorder %v2092_v13, 0.0  ;;  %v2160_v27 = vmul.f32 0.1, %v2092_v13  ;;  %v2095_v57 = vadd.f32 %v2546_v17, %v3992_v60  ;;  %v2086_v36 = vpop.f32.mrb[15].mxu1 }
 0x287   : > { %vm2126_vm11 = vcmp.gt.f32.partialorder %v2084_v37, 0.0  ;;  %v2158_v19 = vmul.f32 0.1, %v2084_v37  ;;  %v2087_v22 = vadd.f32 %v3992_v60, %v2086_v36 }
 0x288   : > { %v2192_v33 = vsel %vm2128_vm10, %v2092_v13, %v2160_v27  ;;  %vm2129_vm12 = vcmp.gt.f32.partialorder %v2095_v57, 0.0  ;;  %v2161_v30 = vmul.f32 0.1, %v2095_v57 }
 0x289   : > { %v2529_v23 = vpop.f32.mrb[12].mxu0  ;;  %2224 = vst [vmem:[%s4001_s14 + $0xf0] sm:$0xff] %v2192_v33  ;;  %v2190_v52 = vsel %vm2126_vm11, %v2084_v37, %v2158_v19  ;;  %vm2127_vm13 = vcmp.gt.f32.partialorder %v2087_v22, 0.0  ;;  %v2159_v51 = vmul.f32 0.1, %v2087_v22 }
 0x28a   : > { %v2028_v61 = vadd.f32 %v2529_v23, %v3992_v60  ;;  %v2019_v32 = vpop.f32.mrb[13].mxu0  ;;  %2222 = vst [vmem:[%s4001_s14 + $0xe0] sm:$0xff] %v2190_v52  ;;  %v2193_v2 = vsel %vm2129_vm12, %v2095_v57, %v2161_v30 }
 0x28b   : > { %v2020_v48 = vadd.f32 %v3992_v60, %v2019_v32  ;;  %v2530_v49 = vpop.f32.mrb[14].mxu0  ;;  %2225 = vst [vmem:[%s4001_s14 + $0xf8] sm:$0xff] %v2193_v2  ;;  %v2191_v56 = vsel %vm2127_vm13, %v2087_v22, %v2159_v51 }
 0x28c   : > { %vm2112_vm14 = vcmp.gt.f32.partialorder %v2028_v61, 0.0  ;;  %v2144_v43 = vmul.f32 0.1, %v2028_v61  ;;  %v2031_v7 = vadd.f32 %v2530_v49, %v3992_v60  ;;  %v2022_v20 = vpop.f32.mrb[15].mxu0  ;;  %2223 = vst [vmem:[%s4001_s14 + $0xe8] sm:$0xff] %v2191_v56 }
 0x28d   : > { %vm2110_vm15 = vcmp.gt.f32.partialorder %v2020_v48, 0.0  ;;  %v2142_v1 = vmul.f32 0.1, %v2020_v48  ;;  %v2023_v59 = vadd.f32 %v3992_v60, %v2022_v20 }
 0x28e   : > { %v2176_v9 = vsel %vm2112_vm14, %v2028_v61, %v2144_v43  ;;  %vm2113_vm0 = vcmp.gt.f32.partialorder %v2031_v7, 0.0  ;;  %v2145_v63 = vmul.f32 0.1, %v2031_v7 }
 0x28f   : > { %2208 = vst [vmem:[%s4001_s14 + $0x70] sm:$0xff] %v2176_v9  ;;  %v2174_v54 = vsel %vm2110_vm15, %v2020_v48, %v2142_v1  ;;  %vm2111_vm1 = vcmp.gt.f32.partialorder %v2023_v59, 0.0  ;;  %v2143_v62 = vmul.f32 0.1, %v2023_v59 }
 0x290   : > { %2206 = vst [vmem:[%s4001_s14 + $0x60] sm:$0xff] %v2174_v54  ;;  %v2177_v50 = vsel %vm2113_vm0, %v2031_v7, %v2145_v63 }
 0x291   : > { %2209 = vst [vmem:[%s4001_s14 + $0x78] sm:$0xff] %v2177_v50  ;;  %v2175_v60 = vsel %vm2111_vm1, %v2023_v59, %v2143_v62 }
 0x292   : > { %2207 = vst [vmem:[%s4001_s14 + $0x68] sm:$0xff] %v2175_v60 }
 0x293   : > { %2667 = shalt.err (!%p2664_p5)
}
 0x294   : > { %s2668_s26 = scalar_lea.hbm %s4064_s18, 4096  ;;  %s2672_s12 = scalar_lea.hbm %s4124_s4, 8192 }
 0x295   : > { %p2669_p6 = scmp.ne.s32.totalorder %s4064_s18, %s2668_s26  ;;  %p2673_p10 = scmp.lt.u32.totalorder %s4064_s18, %s4124_s4 }
 0x296   : > { %p2674_p11 = scmp.lt.u32.totalorder %s2672_s12, %s2668_s26  ;;  %p2676_p13 = scmp.lt.u32.totalorder %s2668_s26, %s4064_s18 }
 0x297   : > { %p2670_p7 = pnand %p2669_p6, %p2810_p4 }
 0x298   : > { %p2675_p12 = por %p2674_p11, %p2673_p10 }
 0x299   : > { %p2671_p9 = pneg %p2670_p7 }
 0x29a   : > { %p2677_p0 = por %p2676_p13, %p2675_p12 }
 0x29c   : > { %p2678_p1 = pnand %p2677_p0, %p2671_p9 }
 0x29e   : > { %2681 = shalt.err (!%p2678_p1)
}
 0x29f   : > { %s2744_s21 = smov 128  }
 0x2a0   : > { %2565 = dma.vmem_to_hbm [thread:$0]  (%p2810_p4), %s4067_s29, 4096, %s4064_s18, %s4073_s6, %s2744_s21, %s2744_s21, %s2736_s10  }
 0x2a1 PF: > { %p2571_p2 = scmp.ge.s32.totalorder %s2732_s20, 2  ;;  %s2259_s30 = sand.u32 1, %s2712_s15  }
 0x2a2   : > { %s2260_s5 = scalar_lea.sflag [#allocation5], %s2259_s30 }
 0x2a3   : > { %p2568_p3 = pnand %p2571_p2, %p2817_p8 }
 0x2a5   : > { %2707 = dma.done.wait (!%p2568_p3), %s2260_s5, 4096  }
 0x2a6   : > { %2709 = vsyncadd (!%p2568_p3), %s2260_s5, 4294963200  ;;  %s17_s20 = sadd.s32 1, %s2732_s20   ;;  %s4166_s15 = smov %s2716_s16 }
 0x2a7   : > { %p14_p5 = scmp.ge.s32.totalorder %s17_s20, 4   ;;  %s4167_s16 = smov %s2720_s17 }
 0x2a8   : > { %s4168_s17 = smov %s2823_s28  ;;  %s4169_s18 = smov %s2728_s19 }
 0x2a9   : > { %s4170_s19 = smov %s4172_s23  ;;  %16 = sbr.rel (!%p14_p5) target bundleno = 4 (0x4), region = 81 }
 0x2b0   :  { %2265 = vsyncpa [#allocation5], 1 }
 0x2b1   :  { %2267 = vsyncpa [#allocation5 + $0x1], 1 }

</bundles_post_ra>
